<compile_context>
chip_gen: v5e
topology: v5e:2x2
jax: 0.10.0
libtpu: 0.0.40
codegen_flags: <defaults>
</compile_context>

<pallas_src>
import functools

import jax
import jax.numpy as jnp
from jax import lax
from jax.experimental import pallas as pl
from jax.experimental.pallas import tpu as pltpu


def _cdiv(a, b):
    return -(-a // b)


# ----------------------------- Pallas kernels -------------------------------

def _conv_relu_pool_kernel(x_ref, w_ref, b_ref, o_ref, *, cout, chunk, n_chunks):
    """Fused Conv2d(pad=1) + bias + ReLU + MaxPool2d(2,2) for one image.

    x_ref : (1, K, L) bf16  -- shifted-slab input: row ((dy*(k+1)+dx)*Cin + ci),
            lane (i*stride + j) holds padded_input[ci, 2i+dy, 2j+dx].
    w_ref : (4*Cout, K) bf16 -- pool phases stacked on M (phase-major rows).
    b_ref : (Cout, 1) f32 conv bias.
    o_ref : (1, Cout, L) bf16 pooled output, lane (i*stride + j) = pooled[i, j].
    """

    def step(off):
        rhs = x_ref[0, :, pl.ds(off, chunk)]                      # (K, chunk)
        acc = jnp.dot(w_ref[...], rhs,
                      preferred_element_type=jnp.float32)          # (4*Cout, chunk)
        m = acc[0:cout]
        for ph in range(1, 4):
            m = jnp.maximum(m, acc[ph * cout:(ph + 1) * cout])     # 2x2 max-pool
        o_ref[0, :, pl.ds(off, chunk)] = jnp.maximum(
            m + b_ref[...], 0.0).astype(o_ref.dtype)

    if n_chunks == 1:
        step(0)
    else:
        def body(c, carry):
            step(pl.multiple_of(c * chunk, 128))
            return carry

        lax.fori_loop(0, n_chunks, body, 0)


def _conv_relu_pool_dense_kernel(x_ref, w_ref, b_ref, wd_ref, bd_ref, o_ref, *,
                                 cout):
    """Last stage: conv+bias+ReLU+pool (single chunk) fused with Linear(676,10)."""
    acc = jnp.dot(w_ref[...], x_ref[0],
                  preferred_element_type=jnp.float32)               # (4*Cout, L)
    m = acc[0:cout]
    for ph in range(1, 4):
        m = jnp.maximum(m, acc[ph * cout:(ph + 1) * cout])
    p_act = jnp.maximum(m + b_ref[...], 0.0)                        # (Cout, L) f32
    # Dense head: each channel's weights live in a disjoint 10-column group
    # (block-diagonal extraction) so no (Cout, L) -> (1, Cout*L) relayout is
    # needed.  wd rows at padded lane positions are zero.
    t = jnp.dot(p_act.astype(jnp.bfloat16), wd_ref[...],
                preferred_element_type=jnp.float32)                 # (Cout, 40)
    out = bd_ref[...]                                               # (1, 10)
    for c in range(cout):
        out = out + t[c:c + 1, 10 * c:10 * (c + 1)]
    o_ref[0] = out


# --------------------------- XLA-side preparation ----------------------------

def _shifted_slabs(act, *, k, rows, stride, kpad):
    """(N,Cin,H,W) -> (N, kpad, rows*stride) bf16 strided space-to-depth slabs:
    slab[(dy*(k+1)+dx)*Cin + ci, i*stride + j] = pad1(act)[ci, 2i+dy, 2j+dx]."""
    n, cin, _, _ = act.shape
    ap = jnp.pad(act, ((0, 0), (0, 0), (1, 1), (1, 1)))   # conv padding = 1
    slabs = []
    for dy in range(k + 1):
        for dx in range(k + 1):
            q = ap[:, :, dy::2, dx::2][:, :, :rows, :stride]
            q = jnp.pad(q, ((0, 0), (0, 0),
                            (0, rows - q.shape[2]), (0, stride - q.shape[3])))
            slabs.append(q)
    x = jnp.concatenate(slabs, axis=1)          # (N, (k+1)^2*Cin, rows, stride)
    if kpad > x.shape[1]:
        x = jnp.pad(x, ((0, 0), (0, kpad - x.shape[1]), (0, 0), (0, 0)))
    return x.reshape(n, kpad, rows * stride).astype(jnp.bfloat16)


def _phase_batched_weights(w, *, k, kpad):
    """(Cout,Cin,k,k) -> (4*Cout, kpad) bf16.  Row block p=(a,b) (pool phase),
    column ((dy*(k+1)+dx)*Cin + ci) holds w[co,ci,dy-a,dx-b] (0 outside kernel),
    so conv-output pixel (2i+a, 2j+b) is one row-block of a single matmul."""
    cout, cin = w.shape[0], w.shape[1]
    zero = jnp.zeros((cout, cin), w.dtype)
    rows = []
    for a in (0, 1):
        for b in (0, 1):
            cols = []
            for dy in range(k + 1):
                for dx in range(k + 1):
                    dh, dw = dy - a, dx - b
                    cols.append(w[:, :, dh, dw]
                                if 0 <= dh < k and 0 <= dw < k else zero)
            rows.append(jnp.concatenate(cols, axis=1))    # (Cout, (k+1)^2*Cin)
    wb = jnp.concatenate(rows, axis=0)                    # (4*Cout, (k+1)^2*Cin)
    if kpad > wb.shape[1]:
        wb = jnp.pad(wb, ((0, 0), (0, kpad - wb.shape[1])))
    return wb.astype(jnp.bfloat16)


def _fused_stage(act, w, b, *, k, stride, chunk_rows, dense=None):
    """One encoder stage (Conv2d(pad=1)+ReLU+MaxPool2d(2,2)) as one pallas_call;
    optionally fuses the final Linear head (dense=(wd, bd))."""
    n, cin, hi, wi = act.shape
    cout = w.shape[0]
    ho, wo = hi + 2 - k + 1, wi + 2 - k + 1
    hq, wq = ho // 2, wo // 2
    n_chunks = _cdiv(hq, chunk_rows)
    hq_pad = n_chunks * chunk_rows
    chunk = chunk_rows * stride
    l = hq_pad * stride
    assert stride >= wq, (stride, wq)
    assert n_chunks == 1 or chunk % 128 == 0, chunk

    kk = (k + 1) ** 2 * cin
    kpad = _cdiv(kk, 16) * 16                 # bf16 sublane tile alignment

    x_in = _shifted_slabs(act, k=k, rows=hq_pad, stride=stride, kpad=kpad)
    wb = _phase_batched_weights(w, k=k, kpad=kpad)
    b2 = b.reshape(cout, 1).astype(jnp.float32)

    cparams = pltpu.CompilerParams(
        dimension_semantics=("parallel",),    # one image per TC on v7x megacore
        vmem_limit_bytes=24 * 1024 * 1024)

    in_specs = [
        pl.BlockSpec((1, kpad, l), lambda i: (i, 0, 0)),
        pl.BlockSpec((4 * cout, kpad), lambda i: (0, 0)),
        pl.BlockSpec((cout, 1), lambda i: (0, 0)),
    ]

    if dense is None:
        out = pl.pallas_call(
            functools.partial(_conv_relu_pool_kernel, cout=cout,
                              chunk=chunk, n_chunks=n_chunks),
            out_shape=jax.ShapeDtypeStruct((n, cout, l), jnp.bfloat16),
            grid=(n,),
            in_specs=in_specs,
            out_specs=pl.BlockSpec((1, cout, l), lambda i: (i, 0, 0)),
            compiler_params=cparams,
        )(x_in, wb, b2)
        # back to a dense (N, Cout, Hq, Wq) activation for the next stage's glue
        return out.reshape(n, cout, hq_pad, stride)[:, :, :hq, :wq]

    assert n_chunks == 1
    wd, bd = dense
    out = pl.pallas_call(
        functools.partial(_conv_relu_pool_dense_kernel, cout=cout),
        out_shape=jax.ShapeDtypeStruct((n, 1, 10), jnp.float32),
        grid=(n,),
        in_specs=in_specs + [
            pl.BlockSpec((l, 4 * 10), lambda i: (0, 0)),
            pl.BlockSpec((1, 10), lambda i: (0, 0)),
        ],
        out_specs=pl.BlockSpec((1, 1, 10), lambda i: (i, 0, 0)),
        compiler_params=cparams,
    )(x_in, wb, b2, wd, bd)
    return out.reshape(n, 10)


# ------------------------------- model ---------------------------------------

def init_params(key):
    ks = jax.random.split(key, 10)

    def conv_w(k, cout, cin, ksz):
        std = (2.0 / (cin * ksz * ksz)) ** 0.5
        return std * jax.random.normal(k, (cout, cin, ksz, ksz), jnp.float32)

    return {
        "w1": conv_w(ks[0], 16, 3, 4),
        "b1": 0.01 * jax.random.normal(ks[1], (16,), jnp.float32),
        "w2": conv_w(ks[2], 4, 16, 3),
        "b2": 0.01 * jax.random.normal(ks[3], (4,), jnp.float32),
        "w3": conv_w(ks[4], 4, 4, 3),
        "b3": 0.01 * jax.random.normal(ks[5], (4,), jnp.float32),
        "w4": conv_w(ks[6], 4, 4, 3),
        "b4": 0.01 * jax.random.normal(ks[7], (4,), jnp.float32),
        "wl": (1.0 / (4 * 13 * 13) ** 0.5)
              * jax.random.normal(ks[8], (10, 4 * 13 * 13), jnp.float32),
        "bl": 0.01 * jax.random.normal(ks[9], (10,), jnp.float32),
    }


def conv_autoencoder_two_forward(x_nchw, p):
    """forward(x) == encoder(x) in the PyTorch module (NCHW in, (N, 10) out)."""
    x = x_nchw.astype(jnp.float32)
    # Per-stage lane row strides: 128 / 64 / 32 / 16 (>= pooled width).
    x = _fused_stage(x, p["w1"], p["b1"], k=4, stride=128, chunk_rows=4)
    x = _fused_stage(x, p["w2"], p["b2"], k=3, stride=64, chunk_rows=14)
    x = _fused_stage(x, p["w3"], p["b3"], k=3, stride=32, chunk_rows=27)

    # Rearrange Linear(4*13*13, 10) weights (torch Flatten is (C,H,W) order)
    # into the kernel's padded flat-spatial layout (stride=16) so the dense
    # head is fused into the last stage's kernel.
    hq = wq = 13
    stride4 = 16
    wd = p["wl"].T.reshape(4, hq, wq, 10)            # (c, i, j, out)
    wd = jnp.transpose(wd, (1, 2, 0, 3))             # (i, j, c, out)
    wd = jnp.pad(wd, ((0, 0), (0, stride4 - wq), (0, 0), (0, 0)))
    wd = wd.reshape(hq * stride4, 4 * 10).astype(jnp.bfloat16)
    bd = p["bl"].reshape(1, 10).astype(jnp.float32)
    return _fused_stage(x, p["w4"], p["b4"], k=3, stride=stride4, chunk_rows=hq,
                        dense=(wd, bd))


# TODO(synk): the decoder (Linear/Unflatten/MaxUnpool2d/Conv2d stack) is defined
# in __init__ but never used by forward(), so it is intentionally not implemented.


def reference_forward(x_nchw, p):
    """Pure-JAX reference with identical semantics, for validation."""
    prec = lax.Precision.HIGHEST

    def conv(x, w, b, pad):
        y = lax.conv_general_dilated(
            x, w, (1, 1), [(pad, pad), (pad, pad)],
            dimension_numbers=("NCHW", "OIHW", "NCHW"), precision=prec)
        return y + b[None, :, None, None]

    def pool(x):
        return lax.reduce_window(x, -jnp.inf, lax.max,
                                 (1, 1, 2, 2), (1, 1, 2, 2), "VALID")

    x = x_nchw.astype(jnp.float32)
    x = pool(jax.nn.relu(conv(x, p["w1"], p["b1"], 1)))
    x = pool(jax.nn.relu(conv(x, p["w2"], p["b2"], 1)))
    x = pool(jax.nn.relu(conv(x, p["w3"], p["b3"], 1)))
    x = pool(jax.nn.relu(conv(x, p["w4"], p["b4"], 1)))
    x = x.reshape(x.shape[0], -1)
    return jnp.dot(x, p["wl"].T, precision=prec) + p["bl"]


if __name__ == "__main__":
    params = init_params(jax.random.PRNGKey(42))
    # Smallest canonical input consistent with Linear(4*13*13, 10): 3x224x224.
    x = jax.random.normal(jax.random.PRNGKey(0), (2, 3, 224, 224), jnp.float32)

    fwd = jax.jit(conv_autoencoder_two_forward)
    out = jax.block_until_ready(fwd(x, params))
    assert out.shape == (2, 10), out.shape
    assert bool(jnp.all(jnp.isfinite(out)))

    ref = jax.block_until_ready(jax.jit(reference_forward)(x, params))
    # bf16 MXU operands + bf16 inter-stage activations (f32 accumulation), so
    # validate against the all-f32 reference with a scaled tolerance.
    max_err = float(jnp.max(jnp.abs(out - ref)))
    scale = float(jnp.max(jnp.abs(ref)))
    assert max_err <= 3e-2 * max(scale, 1.0), (max_err, scale)

    print("KERNEL_OK")
</pallas_src>

<mosaic_0001>
module attributes {stable_mosaic.version = 11 : i64} {
  func.func @_conv_relu_pool_kernel(%arg0: i32, %arg1: memref<1x80x14336xbf16, #tpu.memory_space<vmem>>, %arg2: memref<64x80xbf16, #tpu.memory_space<vmem>>, %arg3: memref<16x1xf32, #tpu.memory_space<vmem>>, %arg4: memref<1x16x14336xbf16, #tpu.memory_space<vmem>>) attributes {dimension_semantics = [#tpu.dimension_semantics<parallel>], iteration_bounds = array<i64: 2>, scalar_prefetch = 0 : i64, scratch_operands = 0 : i64, tpu.core_type = #tpu.core_type<tc>, window_params = [{transform_indices = @transform_0, window_bounds = array<i64: 1, 80, 14336>}, {pipeline_mode = #tpu.pipeline_mode<synchronous>, transform_indices = @transform_1, window_bounds = array<i64: 64, 80>}, {pipeline_mode = #tpu.pipeline_mode<synchronous>, transform_indices = @transform_2, window_bounds = array<i64: 16, 1>}, {transform_indices = @transform_3, window_bounds = array<i64: 1, 16, 14336>}]} {
    %c0_i32 = arith.constant 0 : i32
    %c28_i32 = arith.constant 28 : i32
    %0 = arith.addi %c0_i32, %c28_i32 : i32
    %c1_i32 = arith.constant 1 : i32
    scf.for %arg5 = %c0_i32 to %0 step %c1_i32  : i32 {
      %c512_i32 = arith.constant 512 : i32
      %1 = arith.muli %arg5, %c512_i32 : i32
      %2 = tpu.assume_multiple %1, 128 : i32
      %c0 = arith.constant 0 : index
      %c0_1 = arith.constant 0 : index
      %3 = arith.index_cast %2 : i32 to index
      %4 = vector.load %arg1[%c0, %c0_1, %3] : memref<1x80x14336xbf16, #tpu.memory_space<vmem>>, vector<1x80x512xbf16>
      %5 = vector.shape_cast %4 : vector<1x80x512xbf16> to vector<80x512xbf16>
      %c0_2 = arith.constant 0 : index
      %c0_3 = arith.constant 0 : index
      %6 = vector.load %arg2[%c0_2, %c0_3] : memref<64x80xbf16, #tpu.memory_space<vmem>>, vector<64x80xbf16>
      %cst = arith.constant dense<0.000000e+00> : vector<64x512xf32>
      %7 = tpu.matmul %6, %5, %cst {dimension_numbers = #tpu.dot_dimension_numbers<[1], [0], [0], [1], [0, 0, 1, 1], [], []>} : vector<64x80xbf16>, vector<80x512xbf16>, vector<64x512xf32> -> vector<64x512xf32>
      %8 = vector.extract_strided_slice %7 {offsets = [0, 0], sizes = [16, 512], strides = [1, 1]} : vector<64x512xf32> to vector<16x512xf32>
      %9 = vector.extract_strided_slice %7 {offsets = [16, 0], sizes = [16, 512], strides = [1, 1]} : vector<64x512xf32> to vector<16x512xf32>
      %10 = arith.maximumf %8, %9 : vector<16x512xf32>
      %11 = vector.extract_strided_slice %7 {offsets = [32, 0], sizes = [16, 512], strides = [1, 1]} : vector<64x512xf32> to vector<16x512xf32>
      %12 = arith.maximumf %10, %11 : vector<16x512xf32>
      %13 = vector.extract_strided_slice %7 {offsets = [48, 0], sizes = [16, 512], strides = [1, 1]} : vector<64x512xf32> to vector<16x512xf32>
      %14 = arith.maximumf %12, %13 : vector<16x512xf32>
      %c0_4 = arith.constant 0 : index
      %c0_5 = arith.constant 0 : index
      %15 = vector.load %arg3[%c0_4, %c0_5] : memref<16x1xf32, #tpu.memory_space<vmem>>, vector<16x1xf32>
      %16 = vector.broadcast %15 : vector<16x1xf32> to vector<16x512xf32>
      %17 = arith.addf %14, %16 : vector<16x512xf32>
      %cst_6 = arith.constant 0.000000e+00 : f32
      %18 = vector.broadcast %cst_6 : f32 to vector<16x512xf32>
      %19 = arith.maximumf %17, %18 : vector<16x512xf32>
      %20 = arith.truncf %19 : vector<16x512xf32> to vector<16x512xbf16>
      %c0_7 = arith.constant 0 : index
      %c0_8 = arith.constant 0 : index
      %21 = arith.index_cast %2 : i32 to index
      %22 = vector.load %arg4[%c0_7, %c0_8, %21] : memref<1x16x14336xbf16, #tpu.memory_space<vmem>>, vector<1x16x512xbf16>
      %23 = vector.shape_cast %22 : vector<1x16x512xbf16> to vector<16x512xbf16>
      %24 = vector.shape_cast %20 : vector<16x512xbf16> to vector<1x16x512xbf16>
      tpu.vector_store %arg4[%c0_7, %c0_8, %21], %24 {strides = array<i32>} : memref<1x16x14336xbf16, #tpu.memory_space<vmem>>, vector<1x16x512xbf16>,
    }
    %c28_i32_0 = arith.constant 28 : i32
    return
  }
  func.func @transform_0(%arg0: i32) -> (i32, i32, i32) {
    %c0_i32 = arith.constant 0 : i32
    %c0_i32_0 = arith.constant 0 : i32
    %c0_i32_1 = arith.constant 0 : i32
    return %arg0, %c0_i32, %c0_i32_0 : i32, i32, i32
  }
  func.func @transform_1(%arg0: i32) -> (i32, i32) {
    %c0_i32 = arith.constant 0 : i32
    %c0_i32_0 = arith.constant 0 : i32
    %c0_i32_1 = arith.constant 0 : i32
    return %c0_i32, %c0_i32_0 : i32, i32
  }
  func.func @transform_2(%arg0: i32) -> (i32, i32) {
    %c0_i32 = arith.constant 0 : i32
    %c0_i32_0 = arith.constant 0 : i32
    %c0_i32_1 = arith.constant 0 : i32
    return %c0_i32, %c0_i32_0 : i32, i32
  }
  func.func @transform_3(%arg0: i32) -> (i32, i32, i32) {
    %c0_i32 = arith.constant 0 : i32
    %c0_i32_0 = arith.constant 0 : i32
    %c0_i32_1 = arith.constant 0 : i32
    return %arg0, %c0_i32, %c0_i32_0 : i32, i32, i32
  }
}

module attributes {stable_mosaic.version = 11 : i64} {
  func.func @_conv_relu_pool_kernel(%arg0: i32, %arg1: memref<1x256x3584xbf16, #tpu.memory_space<vmem>>, %arg2: memref<16x256xbf16, #tpu.memory_space<vmem>>, %arg3: memref<4x1xf32, #tpu.memory_space<vmem>>, %arg4: memref<1x4x3584xbf16, #tpu.memory_space<vmem>>) attributes {dimension_semantics = [#tpu.dimension_semantics<parallel>], iteration_bounds = array<i64: 2>, scalar_prefetch = 0 : i64, scratch_operands = 0 : i64, tpu.core_type = #tpu.core_type<tc>, window_params = [{transform_indices = @transform_0, window_bounds = array<i64: 1, 256, 3584>}, {pipeline_mode = #tpu.pipeline_mode<synchronous>, transform_indices = @transform_1, window_bounds = array<i64: 16, 256>}, {pipeline_mode = #tpu.pipeline_mode<synchronous>, transform_indices = @transform_2, window_bounds = array<i64: 4, 1>}, {transform_indices = @transform_3, window_bounds = array<i64: 1, 4, 3584>}]} {
    %c0_i32 = arith.constant 0 : i32
    %c4_i32 = arith.constant 4 : i32
    %0 = arith.addi %c0_i32, %c4_i32 : i32
    %c1_i32 = arith.constant 1 : i32
    scf.for %arg5 = %c0_i32 to %0 step %c1_i32  : i32 {
      %c896_i32 = arith.constant 896 : i32
      %1 = arith.muli %arg5, %c896_i32 : i32
      %2 = tpu.assume_multiple %1, 128 : i32
      %c0 = arith.constant 0 : index
      %c0_1 = arith.constant 0 : index
      %3 = arith.index_cast %2 : i32 to index
      %4 = vector.load %arg1[%c0, %c0_1, %3] : memref<1x256x3584xbf16, #tpu.memory_space<vmem>>, vector<1x256x896xbf16>
      %5 = vector.shape_cast %4 : vector<1x256x896xbf16> to vector<256x896xbf16>
      %c0_2 = arith.constant 0 : index
      %c0_3 = arith.constant 0 : index
      %6 = vector.load %arg2[%c0_2, %c0_3] : memref<16x256xbf16, #tpu.memory_space<vmem>>, vector<16x256xbf16>
      %cst = arith.constant dense<0.000000e+00> : vector<16x896xf32>
      %7 = tpu.matmul %6, %5, %cst {dimension_numbers = #tpu.dot_dimension_numbers<[1], [0], [0], [1], [0, 0, 1, 1], [], []>} : vector<16x256xbf16>, vector<256x896xbf16>, vector<16x896xf32> -> vector<16x896xf32>
      %8 = vector.extract_strided_slice %7 {offsets = [0, 0], sizes = [4, 896], strides = [1, 1]} : vector<16x896xf32> to vector<4x896xf32>
      %9 = vector.extract_strided_slice %7 {offsets = [4, 0], sizes = [4, 896], strides = [1, 1]} : vector<16x896xf32> to vector<4x896xf32>
      %10 = arith.maximumf %8, %9 : vector<4x896xf32>
      %11 = vector.extract_strided_slice %7 {offsets = [8, 0], sizes = [4, 896], strides = [1, 1]} : vector<16x896xf32> to vector<4x896xf32>
      %12 = arith.maximumf %10, %11 : vector<4x896xf32>
      %13 = vector.extract_strided_slice %7 {offsets = [12, 0], sizes = [4, 896], strides = [1, 1]} : vector<16x896xf32> to vector<4x896xf32>
      %14 = arith.maximumf %12, %13 : vector<4x896xf32>
      %c0_4 = arith.constant 0 : index
      %c0_5 = arith.constant 0 : index
      %15 = vector.load %arg3[%c0_4, %c0_5] : memref<4x1xf32, #tpu.memory_space<vmem>>, vector<4x1xf32>
      %16 = vector.broadcast %15 : vector<4x1xf32> to vector<4x896xf32>
      %17 = arith.addf %14, %16 : vector<4x896xf32>
      %cst_6 = arith.constant 0.000000e+00 : f32
      %18 = vector.broadcast %cst_6 : f32 to vector<4x896xf32>
      %19 = arith.maximumf %17, %18 : vector<4x896xf32>
      %20 = arith.truncf %19 : vector<4x896xf32> to vector<4x896xbf16>
      %c0_7 = arith.constant 0 : index
      %c0_8 = arith.constant 0 : index
      %21 = arith.index_cast %2 : i32 to index
      %22 = vector.load %arg4[%c0_7, %c0_8, %21] : memref<1x4x3584xbf16, #tpu.memory_space<vmem>>, vector<1x4x896xbf16>
      %23 = vector.shape_cast %22 : vector<1x4x896xbf16> to vector<4x896xbf16>
      %24 = vector.shape_cast %20 : vector<4x896xbf16> to vector<1x4x896xbf16>
      tpu.vector_store %arg4[%c0_7, %c0_8, %21], %24 {strides = array<i32>} : memref<1x4x3584xbf16, #tpu.memory_space<vmem>>, vector<1x4x896xbf16>,
    }
    %c4_i32_0 = arith.constant 4 : i32
    return
  }
  func.func @transform_0(%arg0: i32) -> (i32, i32, i32) {
    %c0_i32 = arith.constant 0 : i32
    %c0_i32_0 = arith.constant 0 : i32
    %c0_i32_1 = arith.constant 0 : i32
    return %arg0, %c0_i32, %c0_i32_0 : i32, i32, i32
  }
  func.func @transform_1(%arg0: i32) -> (i32, i32) {
    %c0_i32 = arith.constant 0 : i32
    %c0_i32_0 = arith.constant 0 : i32
    %c0_i32_1 = arith.constant 0 : i32
    return %c0_i32, %c0_i32_0 : i32, i32
  }
  func.func @transform_2(%arg0: i32) -> (i32, i32) {
    %c0_i32 = arith.constant 0 : i32
    %c0_i32_0 = arith.constant 0 : i32
    %c0_i32_1 = arith.constant 0 : i32
    return %c0_i32, %c0_i32_0 : i32, i32
  }
  func.func @transform_3(%arg0: i32) -> (i32, i32, i32) {
    %c0_i32 = arith.constant 0 : i32
    %c0_i32_0 = arith.constant 0 : i32
    %c0_i32_1 = arith.constant 0 : i32
    return %arg0, %c0_i32, %c0_i32_0 : i32, i32, i32
  }
}

module attributes {stable_mosaic.version = 11 : i64} {
  func.func @_conv_relu_pool_kernel(%arg0: i32, %arg1: memref<1x64x864xbf16, #tpu.memory_space<vmem>>, %arg2: memref<16x64xbf16, #tpu.memory_space<vmem>>, %arg3: memref<4x1xf32, #tpu.memory_space<vmem>>, %arg4: memref<1x4x864xbf16, #tpu.memory_space<vmem>>) attributes {dimension_semantics = [#tpu.dimension_semantics<parallel>], iteration_bounds = array<i64: 2>, scalar_prefetch = 0 : i64, scratch_operands = 0 : i64, tpu.core_type = #tpu.core_type<tc>, window_params = [{transform_indices = @transform_0, window_bounds = array<i64: 1, 64, 864>}, {pipeline_mode = #tpu.pipeline_mode<synchronous>, transform_indices = @transform_1, window_bounds = array<i64: 16, 64>}, {pipeline_mode = #tpu.pipeline_mode<synchronous>, transform_indices = @transform_2, window_bounds = array<i64: 4, 1>}, {transform_indices = @transform_3, window_bounds = array<i64: 1, 4, 864>}]} {
    %c0 = arith.constant 0 : index
    %c0_0 = arith.constant 0 : index
    %c0_1 = arith.constant 0 : index
    %0 = vector.load %arg1[%c0, %c0_0, %c0_1] : memref<1x64x864xbf16, #tpu.memory_space<vmem>>, vector<1x64x864xbf16>
    %1 = vector.shape_cast %0 : vector<1x64x864xbf16> to vector<64x864xbf16>
    %c0_2 = arith.constant 0 : index
    %c0_3 = arith.constant 0 : index
    %2 = vector.load %arg2[%c0_2, %c0_3] : memref<16x64xbf16, #tpu.memory_space<vmem>>, vector<16x64xbf16>
    %cst = arith.constant dense<0.000000e+00> : vector<16x864xf32>
    %3 = tpu.matmul %2, %1, %cst {dimension_numbers = #tpu.dot_dimension_numbers<[1], [0], [0], [1], [0, 0, 1, 1], [], []>} : vector<16x64xbf16>, vector<64x864xbf16>, vector<16x864xf32> -> vector<16x864xf32>
    %4 = vector.extract_strided_slice %3 {offsets = [0, 0], sizes = [4, 864], strides = [1, 1]} : vector<16x864xf32> to vector<4x864xf32>
    %5 = vector.extract_strided_slice %3 {offsets = [4, 0], sizes = [4, 864], strides = [1, 1]} : vector<16x864xf32> to vector<4x864xf32>
    %6 = arith.maximumf %4, %5 : vector<4x864xf32>
    %7 = vector.extract_strided_slice %3 {offsets = [8, 0], sizes = [4, 864], strides = [1, 1]} : vector<16x864xf32> to vector<4x864xf32>
    %8 = arith.maximumf %6, %7 : vector<4x864xf32>
    %9 = vector.extract_strided_slice %3 {offsets = [12, 0], sizes = [4, 864], strides = [1, 1]} : vector<16x864xf32> to vector<4x864xf32>
    %10 = arith.maximumf %8, %9 : vector<4x864xf32>
    %c0_4 = arith.constant 0 : index
    %c0_5 = arith.constant 0 : index
    %11 = vector.load %arg3[%c0_4, %c0_5] : memref<4x1xf32, #tpu.memory_space<vmem>>, vector<4x1xf32>
    %12 = vector.broadcast %11 : vector<4x1xf32> to vector<4x864xf32>
    %13 = arith.addf %10, %12 : vector<4x864xf32>
    %cst_6 = arith.constant 0.000000e+00 : f32
    %14 = vector.broadcast %cst_6 : f32 to vector<4x864xf32>
    %15 = arith.maximumf %13, %14 : vector<4x864xf32>
    %16 = arith.truncf %15 : vector<4x864xf32> to vector<4x864xbf16>
    %c0_7 = arith.constant 0 : index
    %c0_8 = arith.constant 0 : index
    %c0_9 = arith.constant 0 : index
    %17 = vector.load %arg4[%c0_7, %c0_8, %c0_9] : memref<1x4x864xbf16, #tpu.memory_space<vmem>>, vector<1x4x864xbf16>
    %18 = vector.shape_cast %17 : vector<1x4x864xbf16> to vector<4x864xbf16>
    %19 = vector.shape_cast %16 : vector<4x864xbf16> to vector<1x4x864xbf16>
    tpu.vector_store %arg4[%c0_7, %c0_8, %c0_9], %19 {strides = array<i32>} : memref<1x4x864xbf16, #tpu.memory_space<vmem>>, vector<1x4x864xbf16>,
    return
  }
  func.func @transform_0(%arg0: i32) -> (i32, i32, i32) {
    %c0_i32 = arith.constant 0 : i32
    %c0_i32_0 = arith.constant 0 : i32
    %c0_i32_1 = arith.constant 0 : i32
    return %arg0, %c0_i32, %c0_i32_0 : i32, i32, i32
  }
  func.func @transform_1(%arg0: i32) -> (i32, i32) {
    %c0_i32 = arith.constant 0 : i32
    %c0_i32_0 = arith.constant 0 : i32
    %c0_i32_1 = arith.constant 0 : i32
    return %c0_i32, %c0_i32_0 : i32, i32
  }
  func.func @transform_2(%arg0: i32) -> (i32, i32) {
    %c0_i32 = arith.constant 0 : i32
    %c0_i32_0 = arith.constant 0 : i32
    %c0_i32_1 = arith.constant 0 : i32
    return %c0_i32, %c0_i32_0 : i32, i32
  }
  func.func @transform_3(%arg0: i32) -> (i32, i32, i32) {
    %c0_i32 = arith.constant 0 : i32
    %c0_i32_0 = arith.constant 0 : i32
    %c0_i32_1 = arith.constant 0 : i32
    return %arg0, %c0_i32, %c0_i32_0 : i32, i32, i32
  }
}

module attributes {stable_mosaic.version = 11 : i64} {
  func.func @_conv_relu_pool_dense_kernel(%arg0: i32, %arg1: memref<1x64x208xbf16, #tpu.memory_space<vmem>>, %arg2: memref<16x64xbf16, #tpu.memory_space<vmem>>, %arg3: memref<4x1xf32, #tpu.memory_space<vmem>>, %arg4: memref<208x40xbf16, #tpu.memory_space<vmem>>, %arg5: memref<1x10xf32, #tpu.memory_space<vmem>>, %arg6: memref<1x1x10xf32, #tpu.memory_space<vmem>>) attributes {dimension_semantics = [#tpu.dimension_semantics<parallel>], iteration_bounds = array<i64: 2>, scalar_prefetch = 0 : i64, scratch_operands = 0 : i64, tpu.core_type = #tpu.core_type<tc>, window_params = [{transform_indices = @transform_0, window_bounds = array<i64: 1, 64, 208>}, {pipeline_mode = #tpu.pipeline_mode<synchronous>, transform_indices = @transform_1, window_bounds = array<i64: 16, 64>}, {pipeline_mode = #tpu.pipeline_mode<synchronous>, transform_indices = @transform_2, window_bounds = array<i64: 4, 1>}, {pipeline_mode = #tpu.pipeline_mode<synchronous>, transform_indices = @transform_3, window_bounds = array<i64: 208, 40>}, {pipeline_mode = #tpu.pipeline_mode<synchronous>, transform_indices = @transform_4, window_bounds = array<i64: 1, 10>}, {transform_indices = @transform_5, window_bounds = array<i64: 1, 1, 10>}]} {
    %c0 = arith.constant 0 : index
    %c0_0 = arith.constant 0 : index
    %0 = vector.load %arg2[%c0, %c0_0] : memref<16x64xbf16, #tpu.memory_space<vmem>>, vector<16x64xbf16>
    %c0_1 = arith.constant 0 : index
    %c0_2 = arith.constant 0 : index
    %c0_3 = arith.constant 0 : index
    %1 = vector.load %arg1[%c0_1, %c0_2, %c0_3] : memref<1x64x208xbf16, #tpu.memory_space<vmem>>, vector<1x64x208xbf16>
    %2 = vector.shape_cast %1 : vector<1x64x208xbf16> to vector<64x208xbf16>
    %cst = arith.constant dense<0.000000e+00> : vector<16x208xf32>
    %3 = tpu.matmul %0, %2, %cst {dimension_numbers = #tpu.dot_dimension_numbers<[1], [0], [0], [1], [0, 0, 1, 1], [], []>} : vector<16x64xbf16>, vector<64x208xbf16>, vector<16x208xf32> -> vector<16x208xf32>
    %4 = vector.extract_strided_slice %3 {offsets = [0, 0], sizes = [4, 208], strides = [1, 1]} : vector<16x208xf32> to vector<4x208xf32>
    %5 = vector.extract_strided_slice %3 {offsets = [4, 0], sizes = [4, 208], strides = [1, 1]} : vector<16x208xf32> to vector<4x208xf32>
    %6 = arith.maximumf %4, %5 : vector<4x208xf32>
    %7 = vector.extract_strided_slice %3 {offsets = [8, 0], sizes = [4, 208], strides = [1, 1]} : vector<16x208xf32> to vector<4x208xf32>
    %8 = arith.maximumf %6, %7 : vector<4x208xf32>
    %9 = vector.extract_strided_slice %3 {offsets = [12, 0], sizes = [4, 208], strides = [1, 1]} : vector<16x208xf32> to vector<4x208xf32>
    %10 = arith.maximumf %8, %9 : vector<4x208xf32>
    %c0_4 = arith.constant 0 : index
    %c0_5 = arith.constant 0 : index
    %11 = vector.load %arg3[%c0_4, %c0_5] : memref<4x1xf32, #tpu.memory_space<vmem>>, vector<4x1xf32>
    %12 = vector.broadcast %11 : vector<4x1xf32> to vector<4x208xf32>
    %13 = arith.addf %10, %12 : vector<4x208xf32>
    %cst_6 = arith.constant 0.000000e+00 : f32
    %14 = vector.broadcast %cst_6 : f32 to vector<4x208xf32>
    %15 = arith.maximumf %13, %14 : vector<4x208xf32>
    %16 = arith.truncf %15 : vector<4x208xf32> to vector<4x208xbf16>
    %c0_7 = arith.constant 0 : index
    %c0_8 = arith.constant 0 : index
    %17 = vector.load %arg4[%c0_7, %c0_8] : memref<208x40xbf16, #tpu.memory_space<vmem>>, vector<208x40xbf16>
    %cst_9 = arith.constant dense<0.000000e+00> : vector<4x40xf32>
    %18 = tpu.matmul %16, %17, %cst_9 {dimension_numbers = #tpu.dot_dimension_numbers<[1], [0], [0], [1], [0, 0, 1, 1], [], []>} : vector<4x208xbf16>, vector<208x40xbf16>, vector<4x40xf32> -> vector<4x40xf32>
    %c0_10 = arith.constant 0 : index
    %c0_11 = arith.constant 0 : index
    %19 = vector.load %arg5[%c0_10, %c0_11] : memref<1x10xf32, #tpu.memory_space<vmem>>, vector<1x10xf32>
    %20 = vector.extract_strided_slice %18 {offsets = [0, 0], sizes = [1, 10], strides = [1, 1]} : vector<4x40xf32> to vector<1x10xf32>
    %21 = arith.addf %19, %20 : vector<1x10xf32>
    %22 = vector.extract_strided_slice %18 {offsets = [1, 10], sizes = [1, 10], strides = [1, 1]} : vector<4x40xf32> to vector<1x10xf32>
    %23 = arith.addf %21, %22 : vector<1x10xf32>
    %24 = vector.extract_strided_slice %18 {offsets = [2, 20], sizes = [1, 10], strides = [1, 1]} : vector<4x40xf32> to vector<1x10xf32>
    %25 = arith.addf %23, %24 : vector<1x10xf32>
    %26 = vector.extract_strided_slice %18 {offsets = [3, 30], sizes = [1, 10], strides = [1, 1]} : vector<4x40xf32> to vector<1x10xf32>
    %27 = arith.addf %25, %26 : vector<1x10xf32>
    %c0_12 = arith.constant 0 : index
    %c0_13 = arith.constant 0 : index
    %c0_14 = arith.constant 0 : index
    %28 = vector.load %arg6[%c0_12, %c0_13, %c0_14] : memref<1x1x10xf32, #tpu.memory_space<vmem>>, vector<1x1x10xf32>
    %29 = vector.shape_cast %28 : vector<1x1x10xf32> to vector<1x10xf32>
    %30 = vector.shape_cast %27 : vector<1x10xf32> to vector<1x1x10xf32>
    tpu.vector_store %arg6[%c0_12, %c0_13, %c0_14], %30 {strides = array<i32>} : memref<1x1x10xf32, #tpu.memory_space<vmem>>, vector<1x1x10xf32>,
    return
  }
  func.func @transform_0(%arg0: i32) -> (i32, i32, i32) {
    %c0_i32 = arith.constant 0 : i32
    %c0_i32_0 = arith.constant 0 : i32
    %c0_i32_1 = arith.constant 0 : i32
    return %arg0, %c0_i32, %c0_i32_0 : i32, i32, i32
  }
  func.func @transform_1(%arg0: i32) -> (i32, i32) {
    %c0_i32 = arith.constant 0 : i32
    %c0_i32_0 = arith.constant 0 : i32
    %c0_i32_1 = arith.constant 0 : i32
    return %c0_i32, %c0_i32_0 : i32, i32
  }
  func.func @transform_2(%arg0: i32) -> (i32, i32) {
    %c0_i32 = arith.constant 0 : i32
    %c0_i32_0 = arith.constant 0 : i32
    %c0_i32_1 = arith.constant 0 : i32
    return %c0_i32, %c0_i32_0 : i32, i32
  }
  func.func @transform_3(%arg0: i32) -> (i32, i32) {
    %c0_i32 = arith.constant 0 : i32
    %c0_i32_0 = arith.constant 0 : i32
    %c0_i32_1 = arith.constant 0 : i32
    return %c0_i32, %c0_i32_0 : i32, i32
  }
  func.func @transform_4(%arg0: i32) -> (i32, i32) {
    %c0_i32 = arith.constant 0 : i32
    %c0_i32_0 = arith.constant 0 : i32
    %c0_i32_1 = arith.constant 0 : i32
    return %c0_i32, %c0_i32_0 : i32, i32
  }
  func.func @transform_5(%arg0: i32) -> (i32, i32, i32) {
    %c0_i32 = arith.constant 0 : i32
    %c0_i32_0 = arith.constant 0 : i32
    %c0_i32_1 = arith.constant 0 : i32
    return %arg0, %c0_i32, %c0_i32_0 : i32, i32, i32
  }
}

</mosaic_0001>

<bundles_post_ra>
// kernel: conv_autoencoder_two_forward.4
= control target key start
LH: loop header
LB: loop body
LE: loop exit
PB: predicated region body
PF: predicated region fallthrough
CT: control target
= control target key end

     0   :  { %s791_s12 = smov 0   ;;  %s912_s0 = inlined_call_operand.vmem [shape: bf16[2,80,14336], index: 0, kind: input, shape index: {}]   ;;  %s913_s1 = inlined_call_operand.vmem [shape: bf16[64,80], index: 1, kind: input, shape index: {}]   ;;  %s914_s2 = inlined_call_operand.vmem [shape: f32[16,1], index: 2, kind: input, shape index: {}]   ;;  %s915_s3 = inlined_call_operand.vmem [shape: bf16[2,16,14336], index: 3, kind: output, shape index: {}]  }
   0x1 LB: > { %s586_s13 = sadd.s32 4294967295, %s764_s12   ;;  %p590_p0 = scmp.ge.s32.totalorder %s764_s12, 1  ;;  %s764_s12 = sphi %s791_s12, %s13_s12  }
   0x2   : > { %p137_p1 = scmp.lt.s32.totalorder %s764_s12, 3 }
   0x4   : > { %p138_p2 = pnand %p590_p0, %p137_p1 }
   0x5   : > { %p161_p3 = scmp.lt.s32.totalorder (!%p138_p2), %s586_s13, 1  ;;  %s809_s22 = smov (!%p138_p2), 0  }
   0x6   : > { %141 = sbr.rel (%p138_p2) target bundleno = 242 (0xf2), region = 32 }
   0xb   : > { %s917_s13 = smov (!%p161_p3, %s586_s13), 1 }
   0xc   : > { %s734_s14 = smul.u32 4480, %s917_s13 }
   0xd   : > { %s735_s15 = smul.u32 896, %s917_s13 }
   0xe   : > { %s802_s18 = scalar_lea.vmem %s912_s0, %s734_s14 }
   0xf   : > { %s807_s21 = scalar_lea.vmem %s915_s3, %s735_s15 }
  0x10 LB: >> { %s593_s23 = sshll.u32 %s768_s22, 9  ;;  %v730_v60 = vld [vmem:[%s913_s1] sm:$0xff]  ;;  %vm331_vm0 = vcmask 654336   ;;  %v731_v61 = vld [vmem:[%s913_s1 + $0x8] sm:$0xff]  ;;  %v770_v63 = vmov 0   ;;  %s177_s22 = sadd.s32 1, %s768_s22   ;;  %s768_s22 = sphi %s809_s22, %s177_s22  }
  0x11   : >> { %s815_s24 = sshra.s32 %s593_s23, 7  ;;  %v484_v62 = vld [vmem:[%s914_s2] sm:$0xff]  ;;  %753 = vset.pattern.permute.xlu0 %v770_v63  ;;  %p174_p4 = scmp.ge.s32.totalorder %s177_s22, 28  }
  0x12   : >> { %s594_s25 = sshll.u32 %s815_s24, 2  ;;  %488 = vperm.xlu0 %753, %v484_v62  }
  0x13   : >> { %s821_s26 = scalar_lea.vmem %s802_s18, %s594_s25  ;;  %s900_s13 = scalar_lea.vmem %s807_s21, %s594_s25 }
  0x14   : >> { %v677_v0 = vld [vmem:[%s821_s26 + $0xe00] sm:$0xf]  ;;  %v726_v2 = vld [vmem:[%s821_s26 + $0xe04] sm:$0xf]  ;;  %v685_v5 = vld [vmem:[%s821_s26 + $0xe08] sm:$0xf] }
  0x15   : >> { %v728_v1 = vld [vmem:[%s821_s26 + $0xfbc] sm:$0xf0]  ;;  %v679_v4 = vld [vmem:[%s821_s26 + $0xfc0] sm:$0xf0]  ;;  %v729_v6 = vld [vmem:[%s821_s26 + $0xfc4] sm:$0xf0] }
  0x16   : >> { %v678_v3 = vor.u32 %v728_v1, %v677_v0  ;;  %v682_v7 = vor.u32 %v726_v2, %v679_v4  ;;  %v686_v8 = vor.u32 %v729_v6, %v685_v5  ;;  %v727_v9 = vld [vmem:[%s821_s26 + $0xe0c] sm:$0xf]  ;;  %v661_v11 = vld [vmem:[%s821_s26 + $0xa80] sm:$0xf]  ;;  %v722_v14 = vld [vmem:[%s821_s26 + $0xa84] sm:$0xf] }
  0x17   : >> { %v687_v10 = vld [vmem:[%s821_s26 + $0xfc8] sm:$0xf0]  ;;  %v724_v13 = vld [vmem:[%s821_s26 + $0xc3c] sm:$0xf0]  ;;  %v663_v15 = vld [vmem:[%s821_s26 + $0xc40] sm:$0xf0] }
  0x18   : >> { %347 = vmatpush.bf16.msra.mxu0 %v678_v3  ;;  %v690_v12 = vor.u32 %v727_v9, %v687_v10  ;;  %376 = vmatpush.bf16.msra.mxu1 %v682_v7  ;;  %v662_v16 = vor.u32 %v724_v13, %v661_v11  ;;  %v666_v17 = vor.u32 %v722_v14, %v663_v15  ;;  %v669_v18 = vld [vmem:[%s821_s26 + $0xa88] sm:$0xf]  ;;  %v723_v20 = vld [vmem:[%s821_s26 + $0xa8c] sm:$0xf]  ;;  %v645_v23 = vld [vmem:[%s821_s26 + $0x700] sm:$0xf] }
  0x19   : >> { %405 = vmatpush.bf16.msra.mxu2 %v686_v8  ;;  %v725_v19 = vld [vmem:[%s821_s26 + $0xc44] sm:$0xf0]  ;;  %v671_v22 = vld [vmem:[%s821_s26 + $0xc48] sm:$0xf0]  ;;  %v720_v24 = vld [vmem:[%s821_s26 + $0x8bc] sm:$0xf0] }
  0x1a   : >> { %434 = vmatpush.bf16.msra.mxu3 %v690_v12  ;;  %v670_v21 = vor.u32 %v725_v19, %v669_v18  ;;  %v674_v25 = vor.u32 %v723_v20, %v671_v22  ;;  %v718_v26 = vld [vmem:[%s821_s26 + $0x704] sm:$0xf]  ;;  %v653_v28 = vld [vmem:[%s821_s26 + $0x708] sm:$0xf]  ;;  %v646_v29 = vor.u32 %v720_v24, %v645_v23  ;;  %v719_v31 = vld [vmem:[%s821_s26 + $0x70c] sm:$0xf] }
  0x1b   : >> { %v647_v27 = vld [vmem:[%s821_s26 + $0x8c0] sm:$0xf0]  ;;  %v721_v30 = vld [vmem:[%s821_s26 + $0x8c4] sm:$0xf0]  ;;  %v655_v32 = vld [vmem:[%s821_s26 + $0x8c8] sm:$0xf0] }
  0x1c   : >> { %348 = vmatpush.bf16.msra.mxu0 %v662_v16  ;;  %377 = vmatpush.bf16.msra.mxu1 %v666_v17  ;;  %v650_v33 = vor.u32 %v718_v26, %v647_v27  ;;  %v654_v34 = vor.u32 %v721_v30, %v653_v28  ;;  %v629_v35 = vld [vmem:[%s821_s26 + $0x380] sm:$0xf]  ;;  %v714_v37 = vld [vmem:[%s821_s26 + $0x384] sm:$0xf]  ;;  %v658_v38 = vor.u32 %v719_v31, %v655_v32  ;;  %v637_v40 = vld [vmem:[%s821_s26 + $0x388] sm:$0xf] }
  0x1d   : >> { %406 = vmatpush.bf16.msra.mxu2 %v670_v21  ;;  %v716_v36 = vld [vmem:[%s821_s26 + $0x53c] sm:$0xf0]  ;;  %v631_v39 = vld [vmem:[%s821_s26 + $0x540] sm:$0xf0]  ;;  %v717_v41 = vld [vmem:[%s821_s26 + $0x544] sm:$0xf0] }
  0x1e   : >> { %435 = vmatpush.bf16.msra.mxu3 %v674_v25  ;;  %v715_v42 = vld [vmem:[%s821_s26 + $0x38c] sm:$0xf]  ;;  %v630_v44 = vor.u32 %v716_v36, %v629_v35  ;;  %v634_v45 = vor.u32 %v714_v37, %v631_v39  ;;  %v638_v46 = vor.u32 %v717_v41, %v637_v40  ;;  %v613_v47 = vld [vmem:[%s821_s26] sm:$0xf]  ;;  %v710_v49 = vld [vmem:[%s821_s26 + $0x4] sm:$0xf] }
  0x1f   : >> { %v639_v43 = vld [vmem:[%s821_s26 + $0x548] sm:$0xf0]  ;;  %v712_v48 = vld [vmem:[%s821_s26 + $0x1bc] sm:$0xf0]  ;;  %v615_v51 = vld [vmem:[%s821_s26 + $0x1c0] sm:$0xf0] }
  0x20   : >> { %349 = vmatpush.bf16.msra.mxu0 %v646_v29  ;;  %378 = vmatpush.bf16.msra.mxu1 %v650_v33  ;;  %v642_v50 = vor.u32 %v715_v42, %v639_v43  ;;  %v621_v52 = vld [vmem:[%s821_s26 + $0x8] sm:$0xf]  ;;  %v711_v54 = vld [vmem:[%s821_s26 + $0xc] sm:$0xf]  ;;  %v614_v56 = vor.u32 %v712_v48, %v613_v47  ;;  %v618_v57 = vor.u32 %v710_v49, %v615_v51  ;;  %v732_v1 = vld [vmem:[%s913_s1 + $0x10] sm:$0xff] }
  0x21   : >> { %407 = vmatpush.bf16.msra.mxu2 %v654_v34  ;;  %v713_v53 = vld [vmem:[%s821_s26 + $0x1c4] sm:$0xf0]  ;;  %v623_v55 = vld [vmem:[%s821_s26 + $0x1c8] sm:$0xf0]  ;;  %v733_v2 = vld [vmem:[%s913_s1 + $0x18] sm:$0xff] }
  0x22   : >> { %436 = vmatpush.bf16.msra.mxu3 %v658_v38  ;;  %v622_v58 = vor.u32 %v713_v53, %v621_v52  ;;  %v626_v59 = vor.u32 %v711_v54, %v623_v55  ;;  %v485_v0 = vld [vmem:[%s914_s2 + $0x8] sm:$0xff] }
  0x23   : >> { %493 = vperm.xlu0 %753, %v485_v0  }
  0x24   : >> { %350 = vmatpush.bf16.msra.mxu0 %v630_v44  ;;  %379 = vmatpush.bf16.msra.mxu1 %v634_v45 }
  0x25   : >> { %408 = vmatpush.bf16.msra.mxu2 %v638_v46 }
  0x26   : >> { %437 = vmatpush.bf16.msra.mxu3 %v642_v50 }
  0x28   : >> { %351 = vmatpush.bf16.msra.mxu0 %v614_v56  ;;  %380 = vmatpush.bf16.msra.mxu1 %v618_v57 }
  0x29   : >> { %409 = vmatpush.bf16.msra.mxu2 %v622_v58 }
  0x2a   : >> { %438 = vmatpush.bf16.msra.mxu3 %v626_v59 }
  0x2b   : >> { %691 = vmatmul.msk.bf16.vlgmr.msra.gmra.mxu0 %vm331_vm0, %v730_v60  ;;  %695 = vmatmul.msk.bf16.vlgmr.msra.gmra.mxu1 %vm331_vm0, %v730_v60 }
  0x2c   : >> { %699 = vmatmul.msk.bf16.vlgmr.msra.gmra.mxu2 %vm331_vm0, %v730_v60 }
  0x2d   : >> { %703 = vmatmul.msk.bf16.vlgmr.msra.gmra.mxu3 %vm331_vm0, %v730_v60 }
  0x3b   : >> { %692 = vmatmul.msk.bf16.gmra.mxu0 %vm331_vm0, %v731_v61  ;;  %696 = vmatmul.msk.bf16.gmra.mxu1 %vm331_vm0, %v731_v61 }
  0x3c   : >> { %700 = vmatmul.msk.bf16.gmra.mxu2 %vm331_vm0, %v731_v61 }
  0x3d   : >> { %704 = vmatmul.msk.bf16.gmra.mxu3 %vm331_vm0, %v731_v61 }
  0x4b   : >> { %693 = vmatmul.msk.bf16.gmra.mxu0 %vm331_vm0, %v732_v1  ;;  %697 = vmatmul.msk.bf16.gmra.mxu1 %vm331_vm0, %v732_v1 }
  0x4c   : >> { %701 = vmatmul.msk.bf16.gmra.mxu2 %vm331_vm0, %v732_v1 }
  0x4d   : >> { %705 = vmatmul.msk.bf16.gmra.mxu3 %vm331_vm0, %v732_v1 }
  0x5b   : >> { %694 = vmatmul.msk.bf16.gmra.mxu0 %vm331_vm0, %v733_v2  ;;  %698 = vmatmul.msk.bf16.gmra.mxu1 %vm331_vm0, %v733_v2 }
  0x5c   : >> { %702 = vmatmul.msk.bf16.gmra.mxu2 %vm331_vm0, %v733_v2 }
  0x5d   : >> { %706 = vmatmul.msk.bf16.gmra.mxu3 %vm331_vm0, %v733_v2 }
  0x84   : >> { %v489_v29 = vpop.permute.xlu0 %488 }
  0x95   : >> { %v494_v57 = vpop.permute.xlu0 %493 }
  0xa8   : >> { %v353_v3 = vpop.f32.mrf.mxu0  ;;  %v382_v4 = vpop.f32.mrf.mxu1 }
  0xaf   : >> { %v411_v5 = vpop.f32.mrf.mxu2 }
  0xb0   : >> { %v440_v6 = vpop.f32.mrf.mxu3  ;;  %v355_v7 = vpop.f32.mrf.mxu0 }
  0xb1   : >> { %v384_v8 = vpop.f32.mrf.mxu1 }
  0xb7   : >> { %v413_v9 = vpop.f32.mrf.mxu2 }
  0xb8   : >> { %v442_v10 = vpop.f32.mrf.mxu3  ;;  %v358_v11 = vpop.f32.mrf.mxu0 }
  0xb9   : >> { %v387_v12 = vpop.f32.mrf.mxu1  ;;  %v460_v25 = vmax.f32 %v353_v3, %v358_v11 }
  0xba   : >> { %v461_v26 = vmax.f32 %v382_v4, %v387_v12 }
  0xbf   : >> { %v416_v13 = vpop.f32.mrf.mxu2 }
  0xc0   : >> { %v445_v14 = vpop.f32.mrf.mxu3  ;;  %v360_v15 = vpop.f32.mrf.mxu0  ;;  %v462_v37 = vmax.f32 %v411_v5, %v416_v13 }
  0xc1   : >> { %v389_v16 = vpop.f32.mrf.mxu1  ;;  %v463_v39 = vmax.f32 %v440_v6, %v445_v14  ;;  %v464_v40 = vmax.f32 %v355_v7, %v360_v15 }
  0xc2   : >> { %v465_v42 = vmax.f32 %v384_v8, %v389_v16 }
  0xc7   : >> { %v418_v17 = vpop.f32.mrf.mxu2 }
  0xc8   : >> { %v447_v18 = vpop.f32.mrf.mxu3  ;;  %v363_v19 = vpop.f32.mrf.mxu0  ;;  %v466_v61 = vmax.f32 %v413_v9, %v418_v17 }
  0xc9   : >> { %v392_v20 = vpop.f32.mrf.mxu1  ;;  %v468_v27 = vmax.f32 %v460_v25, %v363_v19  ;;  %v467_v0 = vmax.f32 %v442_v10, %v447_v18 }
  0xca   : >> { %v469_v30 = vmax.f32 %v461_v26, %v392_v20 }
  0xcf   : >> { %v421_v21 = vpop.f32.mrf.mxu2 }
  0xd0   : >> { %v450_v22 = vpop.f32.mrf.mxu3  ;;  %v365_v23 = vpop.f32.mrf.mxu0  ;;  %v470_v43 = vmax.f32 %v462_v37, %v421_v21 }
  0xd1   : >> { %v394_v24 = vpop.f32.mrf.mxu1  ;;  %v471_v45 = vmax.f32 %v463_v39, %v450_v22  ;;  %v472_v46 = vmax.f32 %v464_v40, %v365_v23 }
  0xd2   : >> { %v473_v48 = vmax.f32 %v465_v42, %v394_v24 }
  0xd7   : >> { %v423_v28 = vpop.f32.mrf.mxu2 }
  0xd8   : >> { %v452_v31 = vpop.f32.mrf.mxu3  ;;  %v368_v32 = vpop.f32.mrf.mxu0  ;;  %v474_v3 = vmax.f32 %v466_v61, %v423_v28 }
  0xd9   : >> { %v476_v33 = vmax.f32 %v468_v27, %v368_v32  ;;  %v397_v34 = vpop.f32.mrf.mxu1  ;;  %v475_v5 = vmax.f32 %v467_v0, %v452_v31 }
  0xda   : >> { %v477_v35 = vmax.f32 %v469_v30, %v397_v34 }
  0xdb   : >> { %v496_v36 = vadd.f32 %v489_v29, %v476_v33 }
  0xdc   : >> { %v497_v38 = vadd.f32 %v489_v29, %v477_v35 }
  0xdd   : >> { %v504_v41 = vmax.f32 %v496_v36, 0.0 }
  0xde   : >> { %v505_v44 = vmax.f32 %v497_v38, 0.0 }
  0xdf   : >> { %v426_v47 = vpop.f32.mrf.mxu2 }
  0xe0   : >> { %v512_v49 = vpack.c.bf16 %v505_v44, %v504_v41  ;;  %v478_v50 = vmax.f32 %v470_v43, %v426_v47  ;;  %v455_v51 = vpop.f32.mrf.mxu3  ;;  %v370_v52 = vpop.f32.mrf.mxu0 }
  0xe1   : >> { %v479_v53 = vmax.f32 %v471_v45, %v455_v51  ;;  %v480_v54 = vmax.f32 %v472_v46, %v370_v52  ;;  %v399_v55 = vpop.f32.mrf.mxu1 }
  0xe2   : >> { %518 = vst [vmem:[%s900_s13] sm:$0xff] %v512_v49  ;;  %v498_v56 = vadd.f32 %v489_v29, %v478_v50  ;;  %v481_v58 = vmax.f32 %v473_v48, %v399_v55 }
  0xe3   : >> { %v499_v59 = vadd.f32 %v489_v29, %v479_v53  ;;  %v500_v60 = vadd.f32 %v494_v57, %v480_v54 }
  0xe4   : >> { %v506_v62 = vmax.f32 %v498_v56, 0.0  ;;  %v501_v63 = vadd.f32 %v494_v57, %v481_v58 }
  0xe5   : >> { %v507_v1 = vmax.f32 %v499_v59, 0.0  ;;  %v508_v2 = vmax.f32 %v500_v60, 0.0 }
  0xe6   : >> { %v509_v4 = vmax.f32 %v501_v63, 0.0 }
  0xe7   : >> { %v513_v6 = vpack.c.bf16 %v507_v1, %v506_v62  ;;  %v428_v7 = vpop.f32.mrf.mxu2 }
  0xe8   : >> { %v514_v8 = vpack.c.bf16 %v509_v4, %v508_v2  ;;  %v482_v11 = vmax.f32 %v474_v3, %v428_v7  ;;  %v457_v12 = vpop.f32.mrf.mxu3 }
  0xe9   : >> { %519 = vst [vmem:[%s900_s13 + $0x8] sm:$0xff] %v513_v6  ;;  %v483_v13 = vmax.f32 %v475_v5, %v457_v12 }
  0xea   : >> { %520 = vst [vmem:[%s900_s13 + $0x1c0] sm:$0xff] %v514_v8  ;;  %v502_v14 = vadd.f32 %v494_v57, %v482_v11 }
  0xeb   : >> { %v503_v9 = vadd.f32 %v494_v57, %v483_v13 }
  0xec   : >> { %v510_v15 = vmax.f32 %v502_v14, 0.0 }
  0xed   : >> { %v511_v16 = vmax.f32 %v503_v9, 0.0  ;;  %176 = sbr.rel (!%p174_p4) target bundleno = 16 (0x10), region = 71 }
  0xef   : >> { %v515_v17 = vpack.c.bf16 %v511_v16, %v510_v15 }
  0xf1   : >> { %521 = vst [vmem:[%s900_s13 + $0x1c8] sm:$0xff] %v515_v17 }
  0xf2 PF: > { %s13_s12 = sadd.s32 1, %s764_s12  }
  0xf3   : > { %p10_p5 = scmp.ge.s32.totalorder %s13_s12, 4  }
  0xf5   :  { %12 = sbr.rel (!%p10_p5) target bundleno = 1 (0x1), region = 82 }

// kernel: conv_autoencoder_two_forward.5
= control target key start
LH: loop header
LB: loop body
LE: loop exit
PB: predicated region body
PF: predicated region fallthrough
CT: control target
= control target key end

     0   :  { %s1916_s12 = smov 0   ;;  %s2230_s0 = inlined_call_operand.vmem [shape: bf16[2,256,3584], index: 0, kind: input, shape index: {}]   ;;  %s2231_s1 = inlined_call_operand.vmem [shape: bf16[16,256], index: 1, kind: input, shape index: {}]   ;;  %s2232_s2 = inlined_call_operand.vmem [shape: f32[4,1], index: 2, kind: input, shape index: {}]   ;;  %s2233_s3 = inlined_call_operand.vmem [shape: bf16[2,4,3584], index: 3, kind: output, shape index: {}]  }
   0x1 LB: > { %s1278_s13 = sadd.s32 4294967295, %s1889_s12   ;;  %p1282_p0 = scmp.ge.s32.totalorder %s1889_s12, 1  ;;  %s1889_s12 = sphi %s1916_s12, %s13_s12  }
   0x2   : > { %p137_p1 = scmp.lt.s32.totalorder %s1889_s12, 3 }
   0x4   : > { %p138_p2 = pnand %p1282_p0, %p137_p1 }
   0x5   : > { %p161_p3 = scmp.lt.s32.totalorder (!%p138_p2), %s1278_s13, 1  ;;  %s1934_s22 = smov (!%p138_p2), 0  }
   0x6   : > { %141 = sbr.rel (%p138_p2) target bundleno = 303 (0x12f), region = 32 }
   0xb   : > { %s2235_s13 = smov (!%p161_p3, %s1278_s13), 1 }
   0xc   : > { %s1859_s14 = smul.u32 3584, %s2235_s13 }
   0xd   : > { %s1860_s15 = smul.u32 56, %s2235_s13 }
   0xe   : > { %s1927_s18 = scalar_lea.vmem %s2230_s0, %s1859_s14 }
   0xf   : > { %s1932_s21 = scalar_lea.vmem %s2233_s3, %s1860_s15 }
  0x10 LB: >> { %s177_s23 = smul.u32 896, %s1893_s22  ;;  %vm1195_vm0 = vcmask 1045508   ;;  %vm1191_vm1 = vcmask 1041408   ;;  %vm1199_vm2 = vcmask 1043456   ;;  %s176_s22 = sadd.s32 1, %s1893_s22   ;;  %s1893_s22 = sphi %s1934_s22, %s176_s22  }
  0x11   : >> { %p173_p4 = scmp.ge.s32.totalorder %s176_s22, 4  }
  0x12   : >> { %s1940_s24 = sshra.s32 %s177_s23, 7 }
  0x13   : >> { %s1285_s25 = sshll.u32 %s1940_s24, 2  ;;  %s1742_s10 = sshll.u32 %s1940_s24, 1 }
  0x14   : >> { %s1944_s26 = scalar_lea.vmem %s1927_s18, %s1285_s25  ;;  %s2211_s11 = scalar_lea.vmem %s1932_s21, %s1742_s10 }
  0x15   : >> { %v1492_v0 = vld [vmem:[%s1944_s26 + $0x620] sm:$0xf]  ;;  %v1797_v1 = vld [vmem:[%s1944_s26 + $0x68c] sm:$0xf0]  ;;  %v1794_v5 = vld [vmem:[%s1944_s26 + $0x624] sm:$0xf] }
  0x16   : >> { %v1716_v2 = vld [vmem:[%s1944_s26 + $0xd20] sm:$0xf]  ;;  %v1493_v3 = vor.u32 %v1797_v1, %v1492_v0  ;;  %v1853_v4 = vld [vmem:[%s1944_s26 + $0xd8c] sm:$0xf0]  ;;  %v1494_v6 = vld [vmem:[%s1944_s26 + $0x690] sm:$0xf0] }
  0x17   : >> { %v1717_v7 = vor.u32 %v1853_v4, %v1716_v2  ;;  %v1497_v8 = vor.u32 %v1794_v5, %v1494_v6  ;;  %v1850_v9 = vld [vmem:[%s1944_s26 + $0xd24] sm:$0xf]  ;;  %v1718_v10 = vld [vmem:[%s1944_s26 + $0xd90] sm:$0xf0]  ;;  %v1464_v11 = vld [vmem:[%s1944_s26 + $0x540] sm:$0xf] }
  0x18   : >> { %898 = vmatpush.bf16.msra.mxu0 %v1493_v3  ;;  %v1721_v12 = vor.u32 %v1850_v9, %v1718_v10  ;;  %v1790_v13 = vld [vmem:[%s1944_s26 + $0x5ac] sm:$0xf0]  ;;  %v1688_v14 = vld [vmem:[%s1944_s26 + $0xc40] sm:$0xf]  ;;  %v1787_v18 = vld [vmem:[%s1944_s26 + $0x544] sm:$0xf] }
  0x19   : >> { %v1846_v15 = vld [vmem:[%s1944_s26 + $0xcac] sm:$0xf0]  ;;  %912 = vmatpush.bf16.msra.mxu1 %v1717_v7  ;;  %926 = vmatpush.bf16.msra.mxu2 %v1497_v8  ;;  %v1465_v16 = vor.u32 %v1790_v13, %v1464_v11  ;;  %v1466_v19 = vld [vmem:[%s1944_s26 + $0x5b0] sm:$0xf0]  ;;  %v1843_v20 = vld [vmem:[%s1944_s26 + $0xc44] sm:$0xf] }
  0x1a   : >> { %v1689_v17 = vor.u32 %v1846_v15, %v1688_v14  ;;  %940 = vmatpush.bf16.msra.mxu3 %v1721_v12  ;;  %v1469_v21 = vor.u32 %v1787_v18, %v1466_v19  ;;  %v1690_v22 = vld [vmem:[%s1944_s26 + $0xcb0] sm:$0xf0]  ;;  %v1436_v23 = vld [vmem:[%s1944_s26 + $0x460] sm:$0xf]  ;;  %v1783_v24 = vld [vmem:[%s1944_s26 + $0x4cc] sm:$0xf0] }
  0x1b   : >> { %v1693_v25 = vor.u32 %v1843_v20, %v1690_v22  ;;  %v1660_v26 = vld [vmem:[%s1944_s26 + $0xb60] sm:$0xf]  ;;  %v1839_v27 = vld [vmem:[%s1944_s26 + $0xbcc] sm:$0xf0]  ;;  %v1780_v28 = vld [vmem:[%s1944_s26 + $0x464] sm:$0xf]  ;;  %v1437_v29 = vor.u32 %v1783_v24, %v1436_v23 }
  0x1c   : >> { %899 = vmatpush.bf16.msra.mxu0 %v1465_v16  ;;  %v1438_v30 = vld [vmem:[%s1944_s26 + $0x4d0] sm:$0xf0]  ;;  %v1836_v31 = vld [vmem:[%s1944_s26 + $0xb64] sm:$0xf]  ;;  %v1661_v33 = vor.u32 %v1839_v27, %v1660_v26  ;;  %v1408_v35 = vld [vmem:[%s1944_s26 + $0x380] sm:$0xf] }
  0x1d   : >> { %v1662_v32 = vld [vmem:[%s1944_s26 + $0xbd0] sm:$0xf0]  ;;  %913 = vmatpush.bf16.msra.mxu1 %v1689_v17  ;;  %927 = vmatpush.bf16.msra.mxu2 %v1469_v21  ;;  %v1441_v34 = vor.u32 %v1780_v28, %v1438_v30  ;;  %v1776_v36 = vld [vmem:[%s1944_s26 + $0x3ec] sm:$0xf0]  ;;  %v1632_v37 = vld [vmem:[%s1944_s26 + $0xa80] sm:$0xf] }
  0x1e   : >> { %941 = vmatpush.bf16.msra.mxu3 %v1693_v25  ;;  %v1665_v38 = vor.u32 %v1836_v31, %v1662_v32  ;;  %v1832_v39 = vld [vmem:[%s1944_s26 + $0xaec] sm:$0xf0]  ;;  %v1773_v40 = vld [vmem:[%s1944_s26 + $0x384] sm:$0xf]  ;;  %v1410_v41 = vld [vmem:[%s1944_s26 + $0x3f0] sm:$0xf0]  ;;  %v1409_v44 = vor.u32 %v1776_v36, %v1408_v35 }
  0x1f   : >> { %v1829_v42 = vld [vmem:[%s1944_s26 + $0xa84] sm:$0xf]  ;;  %v1634_v43 = vld [vmem:[%s1944_s26 + $0xaf0] sm:$0xf0]  ;;  %v1633_v45 = vor.u32 %v1832_v39, %v1632_v37  ;;  %v1413_v46 = vor.u32 %v1773_v40, %v1410_v41  ;;  %v1380_v47 = vld [vmem:[%s1944_s26 + $0x2a0] sm:$0xf] }
  0x20   : >> { %900 = vmatpush.bf16.msra.mxu0 %v1437_v29  ;;  %v1769_v48 = vld [vmem:[%s1944_s26 + $0x30c] sm:$0xf0]  ;;  %v1604_v49 = vld [vmem:[%s1944_s26 + $0x9a0] sm:$0xf]  ;;  %v1637_v50 = vor.u32 %v1829_v42, %v1634_v43  ;;  %v1766_v52 = vld [vmem:[%s1944_s26 + $0x2a4] sm:$0xf] }
  0x21   : >> { %914 = vmatpush.bf16.msra.mxu1 %v1661_v33  ;;  %928 = vmatpush.bf16.msra.mxu2 %v1441_v34  ;;  %v1825_v51 = vld [vmem:[%s1944_s26 + $0xa0c] sm:$0xf0]  ;;  %v1382_v53 = vld [vmem:[%s1944_s26 + $0x310] sm:$0xf0]  ;;  %v1822_v54 = vld [vmem:[%s1944_s26 + $0x9a4] sm:$0xf]  ;;  %v1381_v56 = vor.u32 %v1769_v48, %v1380_v47 }
  0x22   : >> { %942 = vmatpush.bf16.msra.mxu3 %v1665_v38  ;;  %v1606_v55 = vld [vmem:[%s1944_s26 + $0xa10] sm:$0xf0]  ;;  %v1605_v57 = vor.u32 %v1825_v51, %v1604_v49  ;;  %v1385_v58 = vor.u32 %v1766_v52, %v1382_v53  ;;  %v1352_v59 = vld [vmem:[%s1944_s26 + $0x1c0] sm:$0xf]  ;;  %v1762_v60 = vld [vmem:[%s1944_s26 + $0x22c] sm:$0xf0] }
  0x23   : >> { %v1576_v61 = vld [vmem:[%s1944_s26 + $0x8c0] sm:$0xf]  ;;  %v1609_v62 = vor.u32 %v1822_v54, %v1606_v55  ;;  %v1818_v63 = vld [vmem:[%s1944_s26 + $0x92c] sm:$0xf0]  ;;  %v1759_v0 = vld [vmem:[%s1944_s26 + $0x1c4] sm:$0xf]  ;;  %v1353_v4 = vor.u32 %v1762_v60, %v1352_v59 }
  0x24   : >> { %901 = vmatpush.bf16.msra.mxu0 %v1409_v44  ;;  %v1354_v1 = vld [vmem:[%s1944_s26 + $0x230] sm:$0xf0]  ;;  %v1815_v2 = vld [vmem:[%s1944_s26 + $0x8c4] sm:$0xf]  ;;  %v1577_v5 = vor.u32 %v1818_v63, %v1576_v61  ;;  %v1324_v7 = vld [vmem:[%s1944_s26 + $0xe0] sm:$0xf] }
  0x25   : >> { %915 = vmatpush.bf16.msra.mxu1 %v1633_v45  ;;  %929 = vmatpush.bf16.msra.mxu2 %v1413_v46  ;;  %v1578_v3 = vld [vmem:[%s1944_s26 + $0x930] sm:$0xf0]  ;;  %v1357_v6 = vor.u32 %v1759_v0, %v1354_v1  ;;  %v1755_v8 = vld [vmem:[%s1944_s26 + $0x14c] sm:$0xf0]  ;;  %v1548_v9 = vld [vmem:[%s1944_s26 + $0x7e0] sm:$0xf] }
  0x26   : >> { %943 = vmatpush.bf16.msra.mxu3 %v1637_v50  ;;  %v1581_v10 = vor.u32 %v1815_v2, %v1578_v3  ;;  %v1811_v11 = vld [vmem:[%s1944_s26 + $0x84c] sm:$0xf0]  ;;  %v1752_v12 = vld [vmem:[%s1944_s26 + $0xe4] sm:$0xf]  ;;  %v1326_v13 = vld [vmem:[%s1944_s26 + $0x150] sm:$0xf0]  ;;  %v1325_v16 = vor.u32 %v1755_v8, %v1324_v7 }
  0x27   : >> { %v1808_v14 = vld [vmem:[%s1944_s26 + $0x7e4] sm:$0xf]  ;;  %v1550_v15 = vld [vmem:[%s1944_s26 + $0x850] sm:$0xf0]  ;;  %v1296_v17 = vld [vmem:[%s1944_s26] sm:$0xf]  ;;  %v1549_v19 = vor.u32 %v1811_v11, %v1548_v9  ;;  %v1329_v20 = vor.u32 %v1752_v12, %v1326_v13 }
  0x28   : >> { %902 = vmatpush.bf16.msra.mxu0 %v1381_v56  ;;  %v1748_v18 = vld [vmem:[%s1944_s26 + $0x6c] sm:$0xf0]  ;;  %v1520_v21 = vld [vmem:[%s1944_s26 + $0x700] sm:$0xf]  ;;  %v1745_v23 = vld [vmem:[%s1944_s26 + $0x4] sm:$0xf]  ;;  %v1553_v24 = vor.u32 %v1808_v14, %v1550_v15 }
  0x29   : >> { %916 = vmatpush.bf16.msra.mxu1 %v1605_v57  ;;  %930 = vmatpush.bf16.msra.mxu2 %v1385_v58  ;;  %v1804_v22 = vld [vmem:[%s1944_s26 + $0x76c] sm:$0xf0]  ;;  %v1298_v25 = vld [vmem:[%s1944_s26 + $0x70] sm:$0xf0]  ;;  %v1801_v26 = vld [vmem:[%s1944_s26 + $0x704] sm:$0xf]  ;;  %v1297_v31 = vor.u32 %v1748_v18, %v1296_v17 }
  0x2a   : >> { %944 = vmatpush.bf16.msra.mxu3 %v1609_v62  ;;  %v1522_v27 = vld [vmem:[%s1944_s26 + $0x770] sm:$0xf0]  ;;  %v1500_v28 = vld [vmem:[%s1944_s26 + $0x628] sm:$0xf]  ;;  %v1798_v29 = vld [vmem:[%s1944_s26 + $0x694] sm:$0xf0]  ;;  %v1521_v35 = vor.u32 %v1804_v22, %v1520_v21  ;;  %v1301_v36 = vor.u32 %v1745_v23, %v1298_v25 }
  0x2b   : >> { %v1724_v30 = vld [vmem:[%s1944_s26 + $0xd28] sm:$0xf]  ;;  %v1854_v32 = vld [vmem:[%s1944_s26 + $0xd94] sm:$0xf0]  ;;  %v1795_v33 = vld [vmem:[%s1944_s26 + $0x62c] sm:$0xf]  ;;  %v1525_v39 = vor.u32 %v1801_v26, %v1522_v27  ;;  %v1501_v40 = vor.u32 %v1798_v29, %v1500_v28 }
  0x2c   : >> { %903 = vmatpush.bf16.msra.mxu0 %v1353_v4  ;;  %v1502_v34 = vld [vmem:[%s1944_s26 + $0x698] sm:$0xf0]  ;;  %v1851_v37 = vld [vmem:[%s1944_s26 + $0xd2c] sm:$0xf]  ;;  %v1472_v41 = vld [vmem:[%s1944_s26 + $0x548] sm:$0xf]  ;;  %v1725_v43 = vor.u32 %v1854_v32, %v1724_v30 }
  0x2d   : >> { %917 = vmatpush.bf16.msra.mxu1 %v1577_v5  ;;  %931 = vmatpush.bf16.msra.mxu2 %v1357_v6  ;;  %v1726_v38 = vld [vmem:[%s1944_s26 + $0xd98] sm:$0xf0]  ;;  %v1791_v42 = vld [vmem:[%s1944_s26 + $0x5b4] sm:$0xf0]  ;;  %v1505_v44 = vor.u32 %v1795_v33, %v1502_v34  ;;  %v1696_v45 = vld [vmem:[%s1944_s26 + $0xc48] sm:$0xf] }
  0x2e   : >> { %945 = vmatpush.bf16.msra.mxu3 %v1581_v10  ;;  %v1847_v46 = vld [vmem:[%s1944_s26 + $0xcb4] sm:$0xf0]  ;;  %v1788_v47 = vld [vmem:[%s1944_s26 + $0x54c] sm:$0xf]  ;;  %v1729_v48 = vor.u32 %v1851_v37, %v1726_v38  ;;  %v1474_v49 = vld [vmem:[%s1944_s26 + $0x5b8] sm:$0xf0]  ;;  %v1473_v55 = vor.u32 %v1791_v42, %v1472_v41 }
  0x2f   : >> { %v1844_v50 = vld [vmem:[%s1944_s26 + $0xc4c] sm:$0xf]  ;;  %v1698_v51 = vld [vmem:[%s1944_s26 + $0xcb8] sm:$0xf0]  ;;  %v1288_v52 = vld [vmem:[%s2231_s1] sm:$0xf]  ;;  %v1697_v58 = vor.u32 %v1847_v46, %v1696_v45  ;;  %v1477_v59 = vor.u32 %v1788_v47, %v1474_v49 }
  0x30   : >> { %904 = vmatpush.bf16.msra.mxu0 %v1325_v16  ;;  %v1858_v53 = vld [vmem:[%s2231_s1 + $0x4] sm:$0xf0]  ;;  %v1857_v54 = vld [vmem:[%s2231_s1 + $0x4] sm:$0xf]  ;;  %v1290_v57 = vld [vmem:[%s2231_s1 + $0x8] sm:$0xf0]  ;;  %v1701_v0 = vor.u32 %v1844_v50, %v1698_v51 }
  0x31   : >> { %918 = vmatpush.bf16.msra.mxu1 %v1549_v19  ;;  %932 = vmatpush.bf16.msra.mxu2 %v1329_v20  ;;  %v2035_v56 = vor.u32 %v1858_v53, %v1288_v52  ;;  %v1444_v60 = vld [vmem:[%s1944_s26 + $0x468] sm:$0xf]  ;;  %v1784_v61 = vld [vmem:[%s1944_s26 + $0x4d4] sm:$0xf0]  ;;  %v2043_v63 = vor.u32 %v1857_v54, %v1290_v57  ;;  %v1781_v2 = vld [vmem:[%s1944_s26 + $0x46c] sm:$0xf] }
  0x32   : >> { %946 = vmatpush.bf16.msra.mxu3 %v1553_v24  ;;  %v1668_v62 = vld [vmem:[%s1944_s26 + $0xb68] sm:$0xf]  ;;  %v1840_v1 = vld [vmem:[%s1944_s26 + $0xbd4] sm:$0xf0]  ;;  %v1446_v3 = vld [vmem:[%s1944_s26 + $0x4d8] sm:$0xf0]  ;;  %v1445_v6 = vor.u32 %v1784_v61, %v1444_v60 }
  0x33   : >> { %v1837_v4 = vld [vmem:[%s1944_s26 + $0xb6c] sm:$0xf]  ;;  %v1670_v5 = vld [vmem:[%s1944_s26 + $0xbd8] sm:$0xf0]  ;;  %v1669_v7 = vor.u32 %v1840_v1, %v1668_v62  ;;  %v1449_v8 = vor.u32 %v1781_v2, %v1446_v3  ;;  %v1416_v9 = vld [vmem:[%s1944_s26 + $0x388] sm:$0xf] }
  0x34   : >> { %905 = vmatpush.bf16.msra.mxu0 %v1297_v31  ;;  %v1777_v10 = vld [vmem:[%s1944_s26 + $0x3f4] sm:$0xf0]  ;;  %v1640_v11 = vld [vmem:[%s1944_s26 + $0xa88] sm:$0xf]  ;;  %v1673_v12 = vor.u32 %v1837_v4, %v1670_v5  ;;  %v1774_v14 = vld [vmem:[%s1944_s26 + $0x38c] sm:$0xf] }
  0x35   : >> { %919 = vmatpush.bf16.msra.mxu1 %v1521_v35  ;;  %933 = vmatpush.bf16.msra.mxu2 %v1301_v36  ;;  %v1833_v13 = vld [vmem:[%s1944_s26 + $0xaf4] sm:$0xf0]  ;;  %v1418_v15 = vld [vmem:[%s1944_s26 + $0x3f8] sm:$0xf0]  ;;  %v1830_v16 = vld [vmem:[%s1944_s26 + $0xa8c] sm:$0xf]  ;;  %v1417_v18 = vor.u32 %v1777_v10, %v1416_v9 }
  0x36   : >> { %947 = vmatpush.bf16.msra.mxu3 %v1525_v39  ;;  %v1642_v17 = vld [vmem:[%s1944_s26 + $0xaf8] sm:$0xf0]  ;;  %v1641_v19 = vor.u32 %v1833_v13, %v1640_v11  ;;  %v1421_v20 = vor.u32 %v1774_v14, %v1418_v15  ;;  %v1388_v21 = vld [vmem:[%s1944_s26 + $0x2a8] sm:$0xf]  ;;  %v1770_v22 = vld [vmem:[%s1944_s26 + $0x314] sm:$0xf0] }
  0x37   : >> { %906 = vmatmul.bf16.vlgmr.msra.gmra.mxu0 %v2035_v56  ;;  %v1612_v23 = vld [vmem:[%s1944_s26 + $0x9a8] sm:$0xf]  ;;  %v1645_v24 = vor.u32 %v1830_v16, %v1642_v17  ;;  %v1826_v25 = vld [vmem:[%s1944_s26 + $0xa14] sm:$0xf0]  ;;  %v1767_v26 = vld [vmem:[%s1944_s26 + $0x2ac] sm:$0xf]  ;;  %v1389_v30 = vor.u32 %v1770_v22, %v1388_v21 }
  0x38   : >> { %954 = vmatpush.bf16.msrb.mxu0 %v1501_v40  ;;  %934 = vmatmul.bf16.vlgmr.msra.gmra.mxu2 %v2035_v56  ;;  %v1390_v27 = vld [vmem:[%s1944_s26 + $0x318] sm:$0xf0]  ;;  %v1823_v28 = vld [vmem:[%s1944_s26 + $0x9ac] sm:$0xf]  ;;  %v1613_v31 = vor.u32 %v1826_v25, %v1612_v23  ;;  %v1360_v33 = vld [vmem:[%s1944_s26 + $0x1c8] sm:$0xf] }
  0x39   : >> { %968 = vmatpush.bf16.msrb.mxu1 %v1725_v43  ;;  %982 = vmatpush.bf16.msrb.mxu2 %v1505_v44  ;;  %v1614_v29 = vld [vmem:[%s1944_s26 + $0xa18] sm:$0xf0]  ;;  %v1393_v32 = vor.u32 %v1767_v26, %v1390_v27  ;;  %v1763_v34 = vld [vmem:[%s1944_s26 + $0x234] sm:$0xf0]  ;;  %v1584_v35 = vld [vmem:[%s1944_s26 + $0x8c8] sm:$0xf] }
  0x3a   : >> { %996 = vmatpush.bf16.msrb.mxu3 %v1729_v48  ;;  %920 = vmatmul.bf16.vlgmr.msra.gmra.mxu1 %v2043_v63  ;;  %v1617_v36 = vor.u32 %v1823_v28, %v1614_v29  ;;  %v1819_v37 = vld [vmem:[%s1944_s26 + $0x934] sm:$0xf0]  ;;  %v1760_v38 = vld [vmem:[%s1944_s26 + $0x1cc] sm:$0xf]  ;;  %v1362_v39 = vld [vmem:[%s1944_s26 + $0x238] sm:$0xf0]  ;;  %v1361_v42 = vor.u32 %v1763_v34, %v1360_v33 }
  0x3b   : >> { %948 = vmatmul.bf16.vlgmr.msra.gmra.mxu3 %v2043_v63  ;;  %v1816_v40 = vld [vmem:[%s1944_s26 + $0x8cc] sm:$0xf]  ;;  %v1586_v41 = vld [vmem:[%s1944_s26 + $0x938] sm:$0xf0]  ;;  %v1585_v43 = vor.u32 %v1819_v37, %v1584_v35  ;;  %v1365_v44 = vor.u32 %v1760_v38, %v1362_v39  ;;  %v1332_v45 = vld [vmem:[%s1944_s26 + $0xe8] sm:$0xf] }
  0x3c   : >> { %955 = vmatpush.bf16.msrb.mxu0 %v1473_v55  ;;  %v1756_v46 = vld [vmem:[%s1944_s26 + $0x154] sm:$0xf0]  ;;  %v1556_v47 = vld [vmem:[%s1944_s26 + $0x7e8] sm:$0xf]  ;;  %v1589_v48 = vor.u32 %v1816_v40, %v1586_v41  ;;  %v1753_v50 = vld [vmem:[%s1944_s26 + $0xec] sm:$0xf] }
  0x3d   : >> { %969 = vmatpush.bf16.msrb.mxu1 %v1697_v58  ;;  %983 = vmatpush.bf16.msrb.mxu2 %v1477_v59  ;;  %v1812_v49 = vld [vmem:[%s1944_s26 + $0x854] sm:$0xf0]  ;;  %v1334_v51 = vld [vmem:[%s1944_s26 + $0x158] sm:$0xf0]  ;;  %v1809_v52 = vld [vmem:[%s1944_s26 + $0x7ec] sm:$0xf]  ;;  %v1333_v55 = vor.u32 %v1756_v46, %v1332_v45 }
  0x3e   : >> { %997 = vmatpush.bf16.msrb.mxu3 %v1701_v0  ;;  %v1558_v53 = vld [vmem:[%s1944_s26 + $0x858] sm:$0xf0]  ;;  %v1304_v54 = vld [vmem:[%s1944_s26 + $0x8] sm:$0xf]  ;;  %v1749_v57 = vld [vmem:[%s1944_s26 + $0x74] sm:$0xf0]  ;;  %v1557_v60 = vor.u32 %v1812_v49, %v1556_v47  ;;  %v1337_v61 = vor.u32 %v1753_v50, %v1334_v51 }
  0x3f   : >> { %v1528_v58 = vld [vmem:[%s1944_s26 + $0x708] sm:$0xf]  ;;  %v1805_v59 = vld [vmem:[%s1944_s26 + $0x774] sm:$0xf0]  ;;  %v1746_v62 = vld [vmem:[%s1944_s26 + $0xc] sm:$0xf]  ;;  %v1561_v1 = vor.u32 %v1809_v52, %v1558_v53  ;;  %v1305_v9 = vor.u32 %v1749_v57, %v1304_v54 }
  0x40   : >> { %956 = vmatpush.bf16.msrb.mxu0 %v1445_v6  ;;  %v1306_v0 = vld [vmem:[%s1944_s26 + $0x78] sm:$0xf0]  ;;  %v1802_v2 = vld [vmem:[%s1944_s26 + $0x70c] sm:$0xf]  ;;  %v1895_v4 = vmov 0   ;;  %v1529_v13 = vor.u32 %v1805_v59, %v1528_v58 }
  0x41   : >> { %970 = vmatpush.bf16.msrb.mxu1 %v1669_v7  ;;  %984 = vmatpush.bf16.msrb.mxu2 %v1449_v8  ;;  %v1530_v3 = vld [vmem:[%s1944_s26 + $0x778] sm:$0xf0]  ;;  %v1157_v5 = vld [vmem:[%s2232_s2] sm:$0xf]  ;;  %v1508_v6 = vld [vmem:[%s1944_s26 + $0x630] sm:$0xf]  ;;  %v1309_v14 = vor.u32 %v1746_v62, %v1306_v0 }
  0x42   : >> { %998 = vmatpush.bf16.msrb.mxu3 %v1673_v12  ;;  %1878 = vset.pattern.permute.xlu0 %v1895_v4  ;;  %v1799_v7 = vld [vmem:[%s1944_s26 + $0x69c] sm:$0xf0]  ;;  %v1732_v8 = vld [vmem:[%s1944_s26 + $0xd30] sm:$0xf]  ;;  %v1796_v11 = vld [vmem:[%s1944_s26 + $0x634] sm:$0xf]  ;;  %v1533_v17 = vor.u32 %v1802_v2, %v1530_v3 }
  0x43   : >> { %1160 = vperm.xlu0 %1878, %v1157_v5   ;;  %v1855_v10 = vld [vmem:[%s1944_s26 + $0xd9c] sm:$0xf0]  ;;  %v1510_v12 = vld [vmem:[%s1944_s26 + $0x6a0] sm:$0xf0]  ;;  %v1852_v15 = vld [vmem:[%s1944_s26 + $0xd34] sm:$0xf] }
  0x44   : >> { %957 = vmatpush.bf16.msrb.mxu0 %v1417_v18  ;;  %v1734_v16 = vld [vmem:[%s1944_s26 + $0xda0] sm:$0xf0]  ;;  %v1509_v18 = vor.u32 %v1799_v7, %v1508_v6  ;;  %v1480_v21 = vld [vmem:[%s1944_s26 + $0x550] sm:$0xf]  ;;  %v1792_v22 = vld [vmem:[%s1944_s26 + $0x5bc] sm:$0xf0] }
  0x45   : >> { %971 = vmatpush.bf16.msrb.mxu1 %v1641_v19  ;;  %985 = vmatpush.bf16.msrb.mxu2 %v1421_v20  ;;  %v1733_v19 = vor.u32 %v1855_v10, %v1732_v8  ;;  %v1513_v20 = vor.u32 %v1796_v11, %v1510_v12  ;;  %v1704_v23 = vld [vmem:[%s1944_s26 + $0xc50] sm:$0xf]  ;;  %v1848_v25 = vld [vmem:[%s1944_s26 + $0xcbc] sm:$0xf0]  ;;  %v1789_v26 = vld [vmem:[%s1944_s26 + $0x554] sm:$0xf] }
  0x46   : >> { %999 = vmatpush.bf16.msrb.mxu3 %v1645_v24  ;;  %v1737_v24 = vor.u32 %v1852_v15, %v1734_v16  ;;  %v1482_v27 = vld [vmem:[%s1944_s26 + $0x5c0] sm:$0xf0]  ;;  %v1845_v28 = vld [vmem:[%s1944_s26 + $0xc54] sm:$0xf]  ;;  %v1452_v33 = vld [vmem:[%s1944_s26 + $0x470] sm:$0xf] }
  0x47   : >> { %v1706_v29 = vld [vmem:[%s1944_s26 + $0xcc0] sm:$0xf0]  ;;  %v1785_v34 = vld [vmem:[%s1944_s26 + $0x4dc] sm:$0xf0]  ;;  %v1676_v35 = vld [vmem:[%s1944_s26 + $0xb70] sm:$0xf] }
  0x48   : >> { %958 = vmatpush.bf16.msrb.mxu0 %v1389_v30  ;;  %v1481_v30 = vor.u32 %v1792_v22, %v1480_v21  ;;  %v1841_v37 = vld [vmem:[%s1944_s26 + $0xbdc] sm:$0xf0]  ;;  %v1782_v38 = vld [vmem:[%s1944_s26 + $0x474] sm:$0xf]  ;;  %v1454_v39 = vld [vmem:[%s1944_s26 + $0x4e0] sm:$0xf0] }
  0x49   : >> { %972 = vmatpush.bf16.msrb.mxu1 %v1613_v31  ;;  %986 = vmatpush.bf16.msrb.mxu2 %v1393_v32  ;;  %v1705_v31 = vor.u32 %v1848_v25, %v1704_v23  ;;  %v1485_v32 = vor.u32 %v1789_v26, %v1482_v27  ;;  %v1838_v40 = vld [vmem:[%s1944_s26 + $0xb74] sm:$0xf]  ;;  %v1678_v41 = vld [vmem:[%s1944_s26 + $0xbe0] sm:$0xf0]  ;;  %v1424_v45 = vld [vmem:[%s1944_s26 + $0x390] sm:$0xf] }
  0x4a   : >> { %1000 = vmatpush.bf16.msrb.mxu3 %v1617_v36  ;;  %v1709_v36 = vor.u32 %v1845_v28, %v1706_v29  ;;  %v1778_v46 = vld [vmem:[%s1944_s26 + $0x3fc] sm:$0xf0]  ;;  %v1648_v47 = vld [vmem:[%s1944_s26 + $0xa90] sm:$0xf]  ;;  %v1775_v50 = vld [vmem:[%s1944_s26 + $0x394] sm:$0xf] }
  0x4b   : >> { %v1834_v49 = vld [vmem:[%s1944_s26 + $0xafc] sm:$0xf0]  ;;  %v1426_v51 = vld [vmem:[%s1944_s26 + $0x400] sm:$0xf0]  ;;  %v1831_v52 = vld [vmem:[%s1944_s26 + $0xa94] sm:$0xf]  ;;  %v1425_v54 = vor.u32 %v1778_v46, %v1424_v45 }
  0x4c   : >> { %959 = vmatpush.bf16.msrb.mxu0 %v1361_v42  ;;  %v1453_v42 = vor.u32 %v1785_v34, %v1452_v33  ;;  %v1650_v53 = vld [vmem:[%s1944_s26 + $0xb00] sm:$0xf0]  ;;  %v1429_v57 = vor.u32 %v1775_v50, %v1426_v51  ;;  %v1396_v58 = vld [vmem:[%s1944_s26 + $0x2b0] sm:$0xf]  ;;  %v1771_v59 = vld [vmem:[%s1944_s26 + $0x31c] sm:$0xf0] }
  0x4d   : >> { %973 = vmatpush.bf16.msrb.mxu1 %v1585_v43  ;;  %987 = vmatpush.bf16.msrb.mxu2 %v1365_v44  ;;  %v1677_v43 = vor.u32 %v1841_v37, %v1676_v35  ;;  %v1457_v44 = vor.u32 %v1782_v38, %v1454_v39  ;;  %v1827_v62 = vld [vmem:[%s1944_s26 + $0xa1c] sm:$0xf0]  ;;  %v1768_v0 = vld [vmem:[%s1944_s26 + $0x2b4] sm:$0xf]  ;;  %v1622_v3 = vld [vmem:[%s1944_s26 + $0xa20] sm:$0xf0]  ;;  %v1397_v4 = vor.u32 %v1771_v59, %v1396_v58 }
  0x4e   : >> { %1001 = vmatpush.bf16.msrb.mxu3 %v1589_v48  ;;  %v1681_v48 = vor.u32 %v1838_v40, %v1678_v41  ;;  %v1824_v2 = vld [vmem:[%s1944_s26 + $0x9b4] sm:$0xf]  ;;  %v1368_v7 = vld [vmem:[%s1944_s26 + $0x1d0] sm:$0xf]  ;;  %v1764_v8 = vld [vmem:[%s1944_s26 + $0x23c] sm:$0xf0] }
  0x4f   : >> { %v1625_v10 = vor.u32 %v1824_v2, %v1622_v3  ;;  %v1820_v11 = vld [vmem:[%s1944_s26 + $0x93c] sm:$0xf0]  ;;  %v1761_v12 = vld [vmem:[%s1944_s26 + $0x1d4] sm:$0xf]  ;;  %v1594_v15 = vld [vmem:[%s1944_s26 + $0x940] sm:$0xf0]  ;;  %v1369_v16 = vor.u32 %v1764_v8, %v1368_v7 }
  0x50   : >> { %960 = vmatpush.bf16.msrb.mxu0 %v1333_v55  ;;  %v1649_v55 = vor.u32 %v1834_v49, %v1648_v47  ;;  %v1564_v21 = vld [vmem:[%s1944_s26 + $0x7f0] sm:$0xf]  ;;  %v1813_v23 = vld [vmem:[%s1944_s26 + $0x85c] sm:$0xf0]  ;;  %v1342_v25 = vld [vmem:[%s1944_s26 + $0x160] sm:$0xf0] }
  0x51   : >> { %974 = vmatpush.bf16.msrb.mxu1 %v1557_v60  ;;  %988 = vmatpush.bf16.msrb.mxu2 %v1337_v61  ;;  %v1620_v60 = vld [vmem:[%s1944_s26 + $0x9b0] sm:$0xf]  ;;  %v1653_v61 = vor.u32 %v1831_v52, %v1650_v53  ;;  %v1810_v26 = vld [vmem:[%s1944_s26 + $0x7f4] sm:$0xf]  ;;  %v1566_v27 = vld [vmem:[%s1944_s26 + $0x860] sm:$0xf0] }
  0x52   : >> { %1002 = vmatpush.bf16.msrb.mxu3 %v1561_v1  ;;  %v1398_v1 = vld [vmem:[%s1944_s26 + $0x320] sm:$0xf0]  ;;  %v1621_v5 = vor.u32 %v1827_v62, %v1620_v60  ;;  %v1312_v29 = vld [vmem:[%s1944_s26 + $0x10] sm:$0xf]  ;;  %v1806_v34 = vld [vmem:[%s1944_s26 + $0x77c] sm:$0xf0]  ;;  %v1569_v35 = vor.u32 %v1810_v26, %v1566_v27 }
  0x53   : >> { %v1401_v6 = vor.u32 %v1768_v0, %v1398_v1  ;;  %v1536_v33 = vld [vmem:[%s1944_s26 + $0x710] sm:$0xf]  ;;  %v1314_v37 = vld [vmem:[%s1944_s26 + $0x80] sm:$0xf0]  ;;  %v1803_v38 = vld [vmem:[%s1944_s26 + $0x714] sm:$0xf] }
  0x54   : >> { %961 = vmatpush.bf16.msrb.mxu0 %v1305_v9  ;;  %v1592_v9 = vld [vmem:[%s1944_s26 + $0x8d0] sm:$0xf]  ;;  %v1538_v39 = vld [vmem:[%s1944_s26 + $0x780] sm:$0xf0]  ;;  %v1516_v40 = vld [vmem:[%s1944_s26 + $0x638] sm:$0xf]  ;;  %v1537_v45 = vor.u32 %v1806_v34, %v1536_v33 }
  0x55   : >> { %975 = vmatpush.bf16.msrb.mxu1 %v1529_v13  ;;  %989 = vmatpush.bf16.msrb.mxu2 %v1309_v14  ;;  %v1370_v13 = vld [vmem:[%s1944_s26 + $0x240] sm:$0xf0]  ;;  %v1817_v14 = vld [vmem:[%s1944_s26 + $0x8d4] sm:$0xf]  ;;  %v1800_v41 = vld [vmem:[%s1944_s26 + $0x6a4] sm:$0xf0]  ;;  %v1541_v47 = vor.u32 %v1803_v38, %v1538_v39 }
  0x56   : >> { %1003 = vmatpush.bf16.msrb.mxu3 %v1533_v17  ;;  %v1593_v17 = vor.u32 %v1820_v11, %v1592_v9  ;;  %v1597_v22 = vor.u32 %v1817_v14, %v1594_v15  ;;  %v1488_v50 = vld [vmem:[%s1944_s26 + $0x558] sm:$0xf]  ;;  %v1793_v51 = vld [vmem:[%s1944_s26 + $0x5c4] sm:$0xf0] }
  0x57   : >> { %962 = vmatmul.bf16.vlgmr.msrb.gmra.mxu0 %v2035_v56  ;;  %v1712_v52 = vld [vmem:[%s1944_s26 + $0xc58] sm:$0xf]  ;;  %v1849_v53 = vld [vmem:[%s1944_s26 + $0xcc4] sm:$0xf0] }
  0x58   : >> { %1010 = vmatpush.bf16.msra.mxu0 %v1509_v18  ;;  %990 = vmatmul.bf16.vlgmr.msrb.gmra.mxu2 %v2035_v56  ;;  %v1373_v18 = vor.u32 %v1761_v12, %v1370_v13  ;;  %v1786_v58 = vld [vmem:[%s1944_s26 + $0x4e4] sm:$0xf0]  ;;  %v1684_v59 = vld [vmem:[%s1944_s26 + $0xb78] sm:$0xf] }
  0x59   : >> { %1024 = vmatpush.bf16.msra.mxu1 %v1733_v19  ;;  %1038 = vmatpush.bf16.msra.mxu2 %v1513_v20  ;;  %v1340_v19 = vld [vmem:[%s1944_s26 + $0xf0] sm:$0xf]  ;;  %v1757_v20 = vld [vmem:[%s1944_s26 + $0x15c] sm:$0xf0]  ;;  %v1842_v60 = vld [vmem:[%s1944_s26 + $0xbe4] sm:$0xf0] }
  0x5a   : >> { %1052 = vmatpush.bf16.msra.mxu3 %v1737_v24  ;;  %976 = vmatmul.bf16.vlgmr.msrb.gmra.mxu1 %v2043_v63  ;;  %v1754_v24 = vld [vmem:[%s1944_s26 + $0xf4] sm:$0xf]  ;;  %v1341_v28 = vor.u32 %v1757_v20, %v1340_v19  ;;  %v1685_v62 = vor.u32 %v1842_v60, %v1684_v59  ;;  %v1432_v0 = vld [vmem:[%s1944_s26 + $0x398] sm:$0xf]  ;;  %v1779_v1 = vld [vmem:[%s1944_s26 + $0x404] sm:$0xf0] }
  0x5b   : >> { %1004 = vmatmul.bf16.vlgmr.msrb.gmra.mxu3 %v2043_v63  ;;  %v1656_v2 = vld [vmem:[%s1944_s26 + $0xa98] sm:$0xf]  ;;  %v1835_v3 = vld [vmem:[%s1944_s26 + $0xb04] sm:$0xf0] }
  0x5c   : >> { %1011 = vmatpush.bf16.msra.mxu0 %v1481_v30  ;;  %v1565_v30 = vor.u32 %v1813_v23, %v1564_v21  ;;  %v1772_v7 = vld [vmem:[%s1944_s26 + $0x324] sm:$0xf0]  ;;  %v1628_v8 = vld [vmem:[%s1944_s26 + $0x9b8] sm:$0xf] }
  0x5d   : >> { %1025 = vmatpush.bf16.msra.mxu1 %v1705_v31  ;;  %1039 = vmatpush.bf16.msra.mxu2 %v1485_v32  ;;  %v1345_v31 = vor.u32 %v1754_v24, %v1342_v25  ;;  %v1750_v32 = vld [vmem:[%s1944_s26 + $0x7c] sm:$0xf0]  ;;  %v1828_v9 = vld [vmem:[%s1944_s26 + $0xa24] sm:$0xf0]  ;;  %v1376_v12 = vld [vmem:[%s1944_s26 + $0x1d8] sm:$0xf] }
  0x5e   : >> { %1053 = vmatpush.bf16.msra.mxu3 %v1709_v36  ;;  %v1747_v36 = vld [vmem:[%s1944_s26 + $0x14] sm:$0xf]  ;;  %v1629_v11 = vor.u32 %v1828_v9, %v1628_v8  ;;  %v1765_v13 = vld [vmem:[%s1944_s26 + $0x244] sm:$0xf0]  ;;  %v1600_v14 = vld [vmem:[%s1944_s26 + $0x8d8] sm:$0xf] }
  0x5f   : >> { %v1317_v46 = vor.u32 %v1747_v36, %v1314_v37  ;;  %v1821_v15 = vld [vmem:[%s1944_s26 + $0x944] sm:$0xf0]  ;;  %v1572_v20 = vld [vmem:[%s1944_s26 + $0x7f8] sm:$0xf] }
  0x60   : >> { %1012 = vmatpush.bf16.msra.mxu0 %v1453_v42  ;;  %v1313_v42 = vor.u32 %v1750_v32, %v1312_v29  ;;  %v1758_v19 = vld [vmem:[%s1944_s26 + $0x164] sm:$0xf0]  ;;  %v1320_v24 = vld [vmem:[%s1944_s26 + $0x18] sm:$0xf] }
  0x61   : >> { %1026 = vmatpush.bf16.msra.mxu1 %v1677_v43  ;;  %1040 = vmatpush.bf16.msra.mxu2 %v1457_v44  ;;  %v1740_v43 = vld [vmem:[%s1944_s26 + $0xd38] sm:$0xf]  ;;  %v1856_v44 = vld [vmem:[%s1944_s26 + $0xda4] sm:$0xf0] }
  0x62   : >> { %1054 = vmatpush.bf16.msra.mxu3 %v1681_v48  ;;  %v1517_v48 = vor.u32 %v1800_v41, %v1516_v40  ;;  %v1741_v49 = vor.u32 %v1856_v44, %v1740_v43  ;;  %v1814_v21 = vld [vmem:[%s1944_s26 + $0x864] sm:$0xf0]  ;;  %v1544_v26 = vld [vmem:[%s1944_s26 + $0x718] sm:$0xf] }
  0x63   : >> { %v1573_v23 = vor.u32 %v1814_v21, %v1572_v20  ;;  %v1751_v25 = vld [vmem:[%s1944_s26 + $0x84] sm:$0xf0] }
  0x64   : >> { %1013 = vmatpush.bf16.msra.mxu0 %v1425_v54  ;;  %v1489_v54 = vor.u32 %v1793_v51, %v1488_v50  ;;  %v1807_v27 = vld [vmem:[%s1944_s26 + $0x784] sm:$0xf0] }
  0x65   : >> { %1027 = vmatpush.bf16.msra.mxu1 %v1649_v55  ;;  %1041 = vmatpush.bf16.msra.mxu2 %v1429_v57  ;;  %v1713_v55 = vor.u32 %v1849_v53, %v1712_v52  ;;  %v1460_v57 = vld [vmem:[%s1944_s26 + $0x478] sm:$0xf]  ;;  %v1545_v29 = vor.u32 %v1807_v27, %v1544_v26 }
  0x66   : >> { %1055 = vmatpush.bf16.msra.mxu3 %v1653_v61  ;;  %v1461_v61 = vor.u32 %v1786_v58, %v1460_v57 }
  0x68   : >> { %1014 = vmatpush.bf16.msra.mxu0 %v1397_v4  ;;  %v1433_v4 = vor.u32 %v1779_v1, %v1432_v0 }
  0x69   : >> { %1028 = vmatpush.bf16.msra.mxu1 %v1621_v5  ;;  %1042 = vmatpush.bf16.msra.mxu2 %v1401_v6  ;;  %v1657_v5 = vor.u32 %v1835_v3, %v1656_v2  ;;  %v1404_v6 = vld [vmem:[%s1944_s26 + $0x2b8] sm:$0xf] }
  0x6a   : >> { %1056 = vmatpush.bf16.msra.mxu3 %v1625_v10  ;;  %v1405_v10 = vor.u32 %v1772_v7, %v1404_v6 }
  0x6c   : >> { %1015 = vmatpush.bf16.msra.mxu0 %v1369_v16  ;;  %v1377_v16 = vor.u32 %v1765_v13, %v1376_v12 }
  0x6d   : >> { %1029 = vmatpush.bf16.msra.mxu1 %v1593_v17  ;;  %1043 = vmatpush.bf16.msra.mxu2 %v1373_v18  ;;  %v1601_v17 = vor.u32 %v1821_v15, %v1600_v14  ;;  %v1348_v18 = vld [vmem:[%s1944_s26 + $0xf8] sm:$0xf] }
  0x6e   : >> { %1057 = vmatpush.bf16.msra.mxu3 %v1597_v22  ;;  %v1349_v22 = vor.u32 %v1758_v19, %v1348_v18 }
  0x70   : >> { %1016 = vmatpush.bf16.msra.mxu0 %v1341_v28  ;;  %v1321_v28 = vor.u32 %v1751_v25, %v1320_v24 }
  0x71   : >> { %1030 = vmatpush.bf16.msra.mxu1 %v1565_v30  ;;  %1044 = vmatpush.bf16.msra.mxu2 %v1345_v31 }
  0x72   : >> { %1058 = vmatpush.bf16.msra.mxu3 %v1569_v35 }
  0x74   : >> { %1017 = vmatpush.bf16.msra.mxu0 %v1313_v42 }
  0x75   : >> { %1031 = vmatpush.bf16.msra.mxu1 %v1537_v45  ;;  %1045 = vmatpush.bf16.msra.mxu2 %v1317_v46 }
  0x76   : >> { %1059 = vmatpush.bf16.msra.mxu3 %v1541_v47 }
  0x77   : >> { %1018 = vmatmul.bf16.vlgmr.msra.gmra.mxu0 %v2035_v56 }
  0x78   : >> { %1066 = vmatpush.bf16.msrb.mxu0 %v1517_v48  ;;  %1046 = vmatmul.bf16.vlgmr.msra.gmra.mxu2 %v2035_v56 }
  0x79   : >> { %1080 = vmatpush.bf16.msrb.mxu1 %v1741_v49  ;;  %1060 = vmatmul.bf16.vlgmr.msra.gmra.mxu3 %v2043_v63 }
  0x7a   : >> { %1032 = vmatmul.bf16.vlgmr.msra.gmra.mxu1 %v2043_v63 }
  0x7c   : >> { %1067 = vmatpush.bf16.msrb.mxu0 %v1489_v54 }
  0x7d   : >> { %1081 = vmatpush.bf16.msrb.mxu1 %v1713_v55 }
  0x80   : >> { %1068 = vmatpush.bf16.msrb.mxu0 %v1461_v61 }
  0x81   : >> { %1082 = vmatpush.bf16.msrb.mxu1 %v1685_v62 }
  0x84   : >> { %1069 = vmatpush.bf16.msrb.mxu0 %v1433_v4 }
  0x85   : >> { %1083 = vmatpush.bf16.msrb.mxu1 %v1657_v5 }
  0x88   : >> { %1070 = vmatpush.bf16.msrb.mxu0 %v1405_v10 }
  0x89   : >> { %1084 = vmatpush.bf16.msrb.mxu1 %v1629_v11 }
  0x8c   : >> { %1071 = vmatpush.bf16.msrb.mxu0 %v1377_v16 }
  0x8d   : >> { %1085 = vmatpush.bf16.msrb.mxu1 %v1601_v17 }
  0x90   : >> { %1072 = vmatpush.bf16.msrb.mxu0 %v1349_v22 }
  0x91   : >> { %1086 = vmatpush.bf16.msrb.mxu1 %v1573_v23 }
  0x94   : >> { %1073 = vmatpush.bf16.msrb.mxu0 %v1321_v28 }
  0x95   : >> { %1087 = vmatpush.bf16.msrb.mxu1 %v1545_v29 }
  0x97   : >> { %1074 = vmatmul.bf16.vlgmr.msrb.gmra.mxu0 %v2035_v56 }
  0x98   : >> { %1088 = vmatmul.bf16.vlgmr.msrb.gmra.mxu1 %v2043_v63 }
  0xb4   : >> { %v907_v30 = vpop.f32.mrf.mxu0 }
  0xb5   : >> { %v2203_v60 = vpop.permute.xlu0 %1160 }
  0xb7   : >> { %v921_v31 = vpop.f32.mrf.mxu1 }
  0xb8   : >> { %v922_v34 = vadd.f32 %v921_v31, %v907_v30 }
  0xba   : >> { %v1101_v38 = vrot.slane %v922_v34, 4 }
  0xbb   : >> { %v935_v32 = vpop.f32.mrf.mxu2 }
  0xbc   : >> { %v909_v35 = vpop.f32.mrf.mxu0  ;;  %v1115_v42 = vmax.f32 %v922_v34, %v1101_v38 }
  0xbe   : >> { %v949_v33 = vpop.f32.mrf.mxu3 }
  0xbf   : >> { %v950_v36 = vadd.f32 %v949_v33, %v935_v32  ;;  %v923_v37 = vpop.f32.mrf.mxu1 }
  0xc0   : >> { %v924_v43 = vadd.f32 %v923_v37, %v909_v35 }
  0xc1   : >> { %v1102_v39 = vrot.slane %v950_v36, 4 }
  0xc2   : >> { %v1122_v63 = vmax.f32 %v1115_v42, %v924_v43  ;;  %v1136_v48 = vrot.slane %v924_v43, 4 }
  0xc3   : >> { %v937_v40 = vpop.f32.mrf.mxu2  ;;  %v1116_v45 = vmax.f32 %v950_v36, %v1102_v39 }
  0xc4   : >> { %v1150_v55 = vmax.f32 %v1122_v63, %v1136_v48 }
  0xc6   : >> { %v951_v41 = vpop.f32.mrf.mxu3  ;;  %v1163_v1 = vadd.f32 %v2203_v60, %v1150_v55 }
  0xc7   : >> { %v952_v46 = vadd.f32 %v951_v41, %v937_v40 }
  0xc8   : >> { %v1170_v10 = vmax.f32 %v1163_v1, 0.0 }
  0xc9   : >> { %v1123_v50 = vmax.f32 %v1116_v45, %v952_v46  ;;  %v1137_v51 = vrot.slane %v952_v46, 4 }
  0xcb   : >> { %v1151_v59 = vmax.f32 %v1123_v50, %v1137_v51 }
  0xcd   : >> { %v1164_v4 = vadd.f32 %v2203_v60, %v1151_v59 }
  0xcf   : >> { %v1171_v11 = vmax.f32 %v1164_v4, 0.0 }
  0xd1   : >> { %v1177_v16 = vpack.c.bf16 %v1171_v11, %v1170_v10 }
  0xd3   : >> { %v1185_v20 = vrot.slane %v1177_v16, 2 }
  0xd4   : >> { %v963_v44 = vpop.f32.mrf.mxu0 }
  0xd5   : >> { %v1194_v25 = vsel %vm1191_vm1, %v1177_v16, %v1185_v20 }
  0xd7   : >> { %v977_v56 = vpop.f32.mrf.mxu1 }
  0xd8   : >> { %v978_v47 = vadd.f32 %v977_v56, %v963_v44 }
  0xda   : >> { %v1103_v49 = vrot.slane %v978_v47, 4 }
  0xdb   : >> { %v991_v52 = vpop.f32.mrf.mxu2 }
  0xdc   : >> { %v1117_v57 = vmax.f32 %v978_v47, %v1103_v49  ;;  %v965_v58 = vpop.f32.mrf.mxu0 }
  0xde   : >> { %v1005_v53 = vpop.f32.mrf.mxu3 }
  0xdf   : >> { %v1006_v54 = vadd.f32 %v1005_v53, %v991_v52  ;;  %v979_v62 = vpop.f32.mrf.mxu1 }
  0xe0   : >> { %v980_v0 = vadd.f32 %v979_v62, %v965_v58 }
  0xe1   : >> { %v1104_v61 = vrot.slane %v1006_v54, 4 }
  0xe2   : >> { %v1124_v2 = vmax.f32 %v1117_v57, %v980_v0  ;;  %v1138_v3 = vrot.slane %v980_v0, 4 }
  0xe3   : >> { %v1118_v5 = vmax.f32 %v1006_v54, %v1104_v61  ;;  %v993_v6 = vpop.f32.mrf.mxu2 }
  0xe4   : >> { %v1152_v7 = vmax.f32 %v1124_v2, %v1138_v3 }
  0xe6   : >> { %v1007_v8 = vpop.f32.mrf.mxu3  ;;  %v1165_v12 = vadd.f32 %v2203_v60, %v1152_v7 }
  0xe7   : >> { %v1008_v9 = vadd.f32 %v1007_v8, %v993_v6 }
  0xe8   : >> { %v1172_v17 = vmax.f32 %v1165_v12, 0.0 }
  0xe9   : >> { %v1125_v13 = vmax.f32 %v1118_v5, %v1008_v9  ;;  %v1139_v14 = vrot.slane %v1008_v9, 4 }
  0xeb   : >> { %v1153_v15 = vmax.f32 %v1125_v13, %v1139_v14 }
  0xed   : >> { %v1166_v18 = vadd.f32 %v2203_v60, %v1153_v15 }
  0xef   : >> { %v1173_v19 = vmax.f32 %v1166_v18, 0.0 }
  0xf1   : >> { %v1178_v21 = vpack.c.bf16 %v1173_v19, %v1172_v17 }
  0xf3   : >> { %v1186_v22 = vrot.slane %v1178_v21, 4  ;;  %v1187_v23 = vrot.slane %v1178_v21, 6 }
  0xf4   : >> { %v1019_v27 = vpop.f32.mrf.mxu0 }
  0xf5   : >> { %v1198_v24 = vsel %vm1195_vm0, %v1186_v22, %v1187_v23 }
  0xf6   : >> { %v1200_v26 = vsel %vm1199_vm2, %v1194_v25, %v1198_v24 }
  0xf7   : >> { %1212 = vst [vmem:[%s2211_s11] sm:$0xff] %v1200_v26  ;;  %v1033_v28 = vpop.f32.mrf.mxu1 }
  0xf8   : >> { %v1034_v31 = vadd.f32 %v1033_v28, %v1019_v27 }
  0xfa   : >> { %v1105_v33 = vrot.slane %v1034_v31, 4 }
  0xfb   : >> { %v1047_v29 = vpop.f32.mrf.mxu2 }
  0xfc   : >> { %v1061_v30 = vpop.f32.mrf.mxu3  ;;  %v1021_v35 = vpop.f32.mrf.mxu0  ;;  %v1119_v39 = vmax.f32 %v1034_v31, %v1105_v33 }
  0xfd   : >> { %v1062_v32 = vadd.f32 %v1061_v30, %v1047_v29 }
  0xff   : >> { %v1106_v34 = vrot.slane %v1062_v32, 4  ;;  %v1035_v36 = vpop.f32.mrf.mxu1 }
 0x100   : >> { %v1036_v41 = vadd.f32 %v1035_v36, %v1021_v35 }
 0x101   : >> { %v1120_v40 = vmax.f32 %v1062_v32, %v1106_v34 }
 0x102   : >> { %v1126_v43 = vmax.f32 %v1119_v39, %v1036_v41  ;;  %v1140_v44 = vrot.slane %v1036_v41, 4 }
 0x103   : >> { %v1049_v37 = vpop.f32.mrf.mxu2 }
 0x104   : >> { %v1063_v38 = vpop.f32.mrf.mxu3  ;;  %v1154_v48 = vmax.f32 %v1126_v43, %v1140_v44 }
 0x105   : >> { %v1064_v42 = vadd.f32 %v1063_v38, %v1049_v37 }
 0x106   : >> { %v1167_v51 = vadd.f32 %v2203_v60, %v1154_v48 }
 0x107   : >> { %v1127_v45 = vmax.f32 %v1120_v40, %v1064_v42  ;;  %v1141_v46 = vrot.slane %v1064_v42, 4 }
 0x108   : >> { %v1174_v58 = vmax.f32 %v1167_v51, 0.0 }
 0x109   : >> { %v1155_v49 = vmax.f32 %v1127_v45, %v1141_v46 }
 0x10b   : >> { %v1168_v52 = vadd.f32 %v2203_v60, %v1155_v49 }
 0x10d   : >> { %v1175_v59 = vmax.f32 %v1168_v52, 0.0 }
 0x10f   : >> { %v1179_v1 = vpack.c.bf16 %v1175_v59, %v1174_v58 }
 0x111   : >> { %v1188_v4 = vrot.slane %v1179_v1, 2 }
 0x113   : >> { %v1203_v8 = vsel %vm1191_vm1, %v1179_v1, %v1188_v4 }
 0x114   : >> { %v1075_v56 = vpop.f32.mrf.mxu0 }
 0x115   : >> { %v1089_v47 = vpop.f32.mrf.mxu1 }
 0x116   : >> { %v1090_v63 = vadd.f32 %v1089_v47, %v1075_v56 }
 0x118   : >> { %v1107_v50 = vrot.slane %v1090_v63, 4 }
 0x11a   : >> { %v1121_v55 = vmax.f32 %v1090_v63, %v1107_v50 }
 0x11c   : >> { %v1077_v53 = vpop.f32.mrf.mxu0 }
 0x11d   : >> { %v1091_v54 = vpop.f32.mrf.mxu1 }
 0x11e   : >> { %v1092_v57 = vadd.f32 %v1091_v54, %v1077_v53 }
 0x120   : >> { %v1128_v61 = vmax.f32 %v1121_v55, %v1092_v57  ;;  %v1142_v62 = vrot.slane %v1092_v57, 4 }
 0x122   : >> { %v1156_v0 = vmax.f32 %v1128_v61, %v1142_v62 }
 0x124   : >> { %v1169_v2 = vadd.f32 %v2203_v60, %v1156_v0 }
 0x126   : >> { %v1176_v3 = vmax.f32 %v1169_v2, 0.0 }
 0x128   : >> { %v1180_v5 = vpack.c.bf16 %v1176_v3, %v1176_v3 }
 0x12a   : >> { %v1189_v6 = vrot.slane %v1180_v5, 4  ;;  %v1190_v7 = vrot.slane %v1180_v5, 6  ;;  %175 = sbr.rel (!%p173_p4) target bundleno = 16 (0x10), region = 71 }
 0x12c   : >> { %v1206_v9 = vsel %vm1195_vm0, %v1189_v6, %v1190_v7 }
 0x12d   : >> { %v1207_v10 = vsel %vm1199_vm2, %v1203_v8, %v1206_v9 }
 0x12e   : >> { %1213 = vst [vmem:[%s2211_s11 + $0x8] sm:$0x3f] %v1207_v10 }
 0x12f PF: > { %s13_s12 = sadd.s32 1, %s1889_s12  }
 0x130   : > { %p10_p5 = scmp.ge.s32.totalorder %s13_s12, 4  }
 0x132   :  { %12 = sbr.rel (!%p10_p5) target bundleno = 1 (0x1), region = 82 }

// kernel: conv_autoencoder_two_forward.6
= control target key start
LH: loop header
LB: loop body
LE: loop exit
PB: predicated region body
PF: predicated region fallthrough
CT: control target
= control target key end

     0   :  { %s836_s12 = smov 0   ;;  %s935_s0 = inlined_call_operand.vmem [shape: bf16[2,64,864], index: 0, kind: input, shape index: {}]   ;;  %s936_s1 = inlined_call_operand.vmem [shape: bf16[16,64], index: 1, kind: input, shape index: {}]   ;;  %s937_s2 = inlined_call_operand.vmem [shape: f32[4,1], index: 2, kind: input, shape index: {}]   ;;  %s938_s3 = inlined_call_operand.vmem [shape: bf16[2,4,864], index: 3, kind: output, shape index: {}]  }
   0x1 LB: > { %s634_s13 = sadd.s32 4294967295, %s813_s12   ;;  %p638_p0 = scmp.ge.s32.totalorder %s813_s12, 1  ;;  %s813_s12 = sphi %s836_s12, %s13_s12  }
   0x2   : > { %p137_p1 = scmp.lt.s32.totalorder %s813_s12, 3 }
   0x4   : > { %p138_p2 = pnand %p638_p0, %p137_p1 }
   0x5   : > { %p161_p3 = scmp.lt.s32.totalorder (!%p138_p2), %s634_s13, 1 }
   0x6   : > { %141 = sbr.rel (%p138_p2) target bundleno = 205 (0xcd), region = 32 }
   0xb   : > { %s940_s13 = smov (!%p161_p3, %s634_s13), 1  ;;  %v794_v55 = vld [vmem:[%s936_s1] sm:$0xff]  ;;  %vm355_vm0 = vcmask 523264   ;;  %vm558_vm1 = vcmask 1045508   ;;  %vm554_vm2 = vcmask 1041408   ;;  %vm562_vm3 = vcmask 1043456  }
   0xc   : > { %s795_s14 = smul.u32 224, %s940_s13  ;;  %vm574_vm4 = vcmask 1043458   ;;  %vm576_vm6 = vcmask 783364  }
   0xd   : > { %s796_s22 = smul.u32 14, %s940_s13  ;;  %vm575_vm5 = vmor %vm574_vm4, %vm554_vm2 }
   0xe   : > { %s850_s17 = scalar_lea.vmem %s935_s0, %s795_s14  ;;  %vm577_vm7 = vmor %vm576_vm6, %vm575_vm5 }
   0xf   : > { %v731_v0 = vld [vmem:[%s850_s17 + $0xa8] sm:$0xf]  ;;  %v790_v1 = vld [vmem:[%s850_s17 + $0xc0] sm:$0xf0]  ;;  %v787_v2 = vld [vmem:[%s850_s17 + $0xac] sm:$0xf]  ;;  %s170_s25 = scalar_lea.vmem %s938_s3, %s796_s22 }
  0x10   : > { %v732_v3 = vor.u32 %v790_v1, %v731_v0  ;;  %v733_v4 = vld [vmem:[%s850_s17 + $0xc4] sm:$0xf0]  ;;  %v739_v5 = vld [vmem:[%s850_s17 + $0xb0] sm:$0xf]  ;;  %v791_v6 = vld [vmem:[%s850_s17 + $0xc8] sm:$0xf0] }
  0x11   : > { %v736_v7 = vor.u32 %v787_v2, %v733_v4  ;;  %v740_v8 = vor.u32 %v791_v6, %v739_v5  ;;  %v788_v9 = vld [vmem:[%s850_s17 + $0xb4] sm:$0xf]  ;;  %v741_v10 = vld [vmem:[%s850_s17 + $0xcc] sm:$0xf0]  ;;  %v783_v13 = vld [vmem:[%s850_s17 + $0x88] sm:$0xf0] }
  0x12   : > { %v703_v11 = vld [vmem:[%s850_s17 + $0x70] sm:$0xf]  ;;  %363 = vmatpush.bf16.msra.mxu0 %v732_v3  ;;  %v744_v12 = vor.u32 %v788_v9, %v741_v10  ;;  %v780_v14 = vld [vmem:[%s850_s17 + $0x74] sm:$0xf]  ;;  %v711_v18 = vld [vmem:[%s850_s17 + $0x78] sm:$0xf] }
  0x13   : > { %v705_v15 = vld [vmem:[%s850_s17 + $0x8c] sm:$0xf0]  ;;  %377 = vmatpush.bf16.msra.mxu1 %v736_v7  ;;  %391 = vmatpush.bf16.msra.mxu2 %v740_v8  ;;  %v704_v16 = vor.u32 %v783_v13, %v703_v11  ;;  %v784_v19 = vld [vmem:[%s850_s17 + $0x90] sm:$0xf0]  ;;  %v781_v20 = vld [vmem:[%s850_s17 + $0x7c] sm:$0xf] }
  0x14   : > { %v708_v17 = vor.u32 %v780_v14, %v705_v15  ;;  %405 = vmatpush.bf16.msra.mxu3 %v744_v12  ;;  %v712_v21 = vor.u32 %v784_v19, %v711_v18  ;;  %v713_v22 = vld [vmem:[%s850_s17 + $0x94] sm:$0xf0]  ;;  %v776_v24 = vld [vmem:[%s850_s17 + $0x50] sm:$0xf0]  ;;  %v773_v26 = vld [vmem:[%s850_s17 + $0x3c] sm:$0xf] }
  0x15   : > { %v675_v23 = vld [vmem:[%s850_s17 + $0x38] sm:$0xf]  ;;  %v716_v25 = vor.u32 %v781_v20, %v713_v22  ;;  %v683_v28 = vld [vmem:[%s850_s17 + $0x40] sm:$0xf]  ;;  %v777_v30 = vld [vmem:[%s850_s17 + $0x58] sm:$0xf0] }
  0x16   : > { %v677_v27 = vld [vmem:[%s850_s17 + $0x54] sm:$0xf0]  ;;  %364 = vmatpush.bf16.msra.mxu0 %v704_v16  ;;  %v676_v29 = vor.u32 %v776_v24, %v675_v23  ;;  %v774_v31 = vld [vmem:[%s850_s17 + $0x44] sm:$0xf]  ;;  %v685_v32 = vld [vmem:[%s850_s17 + $0x5c] sm:$0xf0]  ;;  %v684_v34 = vor.u32 %v777_v30, %v683_v28 }
  0x17   : > { %378 = vmatpush.bf16.msra.mxu1 %v708_v17  ;;  %392 = vmatpush.bf16.msra.mxu2 %v712_v21  ;;  %v680_v33 = vor.u32 %v773_v26, %v677_v27  ;;  %v647_v35 = vld [vmem:[%s850_s17] sm:$0xf]  ;;  %v769_v36 = vld [vmem:[%s850_s17 + $0x18] sm:$0xf0]  ;;  %v766_v37 = vld [vmem:[%s850_s17 + $0x4] sm:$0xf]  ;;  %v688_v38 = vor.u32 %v774_v31, %v685_v32 }
  0x18   : > { %406 = vmatpush.bf16.msra.mxu3 %v716_v25  ;;  %v649_v39 = vld [vmem:[%s850_s17 + $0x1c] sm:$0xf0]  ;;  %v655_v40 = vld [vmem:[%s850_s17 + $0x8] sm:$0xf]  ;;  %v770_v41 = vld [vmem:[%s850_s17 + $0x20] sm:$0xf0]  ;;  %v648_v45 = vor.u32 %v769_v36, %v647_v35 }
  0x19   : > { %v767_v42 = vld [vmem:[%s850_s17 + $0xc] sm:$0xf]  ;;  %v657_v43 = vld [vmem:[%s850_s17 + $0x24] sm:$0xf0]  ;;  %v755_v44 = vld [vmem:[%s850_s17 + $0xc0] sm:$0xf]  ;;  %v652_v47 = vor.u32 %v766_v37, %v649_v39  ;;  %v656_v48 = vor.u32 %v770_v41, %v655_v40 }
  0x1a   : > { %365 = vmatpush.bf16.msra.mxu0 %v676_v29  ;;  %v793_v46 = vld [vmem:[%s850_s17 + $0xd8] sm:$0xf0]  ;;  %v749_v50 = vld [vmem:[%s850_s17 + $0xd4] sm:$0xf0]  ;;  %v660_v51 = vor.u32 %v767_v42, %v657_v43  ;;  %v792_v54 = vld [vmem:[%s850_s17 + $0xd0] sm:$0xf0] }
  0x1b   : > { %379 = vmatpush.bf16.msra.mxu1 %v680_v33  ;;  %393 = vmatpush.bf16.msra.mxu2 %v684_v34  ;;  %v789_v49 = vld [vmem:[%s850_s17 + $0xbc] sm:$0xf]  ;;  %v756_v52 = vor.u32 %v793_v46, %v755_v44  ;;  %v747_v53 = vld [vmem:[%s850_s17 + $0xb8] sm:$0xf]  ;;  %v727_v57 = vld [vmem:[%s850_s17 + $0x88] sm:$0xf] }
  0x1c   : > { %407 = vmatpush.bf16.msra.mxu3 %v688_v38  ;;  %v752_v56 = vor.u32 %v789_v49, %v749_v50  ;;  %v786_v58 = vld [vmem:[%s850_s17 + $0xa0] sm:$0xf0]  ;;  %v721_v60 = vld [vmem:[%s850_s17 + $0x9c] sm:$0xf0]  ;;  %v748_v61 = vor.u32 %v792_v54, %v747_v53  ;;  %v785_v0 = vld [vmem:[%s850_s17 + $0x98] sm:$0xf0] }
  0x1d   : > { %v782_v59 = vld [vmem:[%s850_s17 + $0x84] sm:$0xf]  ;;  %v728_v62 = vor.u32 %v786_v58, %v727_v57  ;;  %v719_v63 = vld [vmem:[%s850_s17 + $0x80] sm:$0xf]  ;;  %v699_v2 = vld [vmem:[%s850_s17 + $0x50] sm:$0xf] }
  0x1e   : > { %366 = vmatpush.bf16.msra.mxu0 %v648_v45  ;;  %v724_v1 = vor.u32 %v782_v59, %v721_v60  ;;  %v779_v3 = vld [vmem:[%s850_s17 + $0x68] sm:$0xf0]  ;;  %v693_v5 = vld [vmem:[%s850_s17 + $0x64] sm:$0xf0]  ;;  %v520_v6 = vld [vmem:[%s937_s2] sm:$0xf]  ;;  %v720_v7 = vor.u32 %v785_v0, %v719_v63 }
  0x1f   : > { %380 = vmatpush.bf16.msra.mxu1 %v652_v47  ;;  %394 = vmatpush.bf16.msra.mxu2 %v656_v48  ;;  %v775_v4 = vld [vmem:[%s850_s17 + $0x4c] sm:$0xf]  ;;  %v700_v8 = vor.u32 %v779_v3, %v699_v2  ;;  %v691_v9 = vld [vmem:[%s850_s17 + $0x48] sm:$0xf]  ;;  %v778_v10 = vld [vmem:[%s850_s17 + $0x60] sm:$0xf0] }
  0x20   : > { %408 = vmatpush.bf16.msra.mxu3 %v660_v51  ;;  %v815_v11 = vmov 0   ;;  %v696_v12 = vor.u32 %v775_v4, %v693_v5  ;;  %v671_v13 = vld [vmem:[%s850_s17 + $0x18] sm:$0xf]  ;;  %v772_v14 = vld [vmem:[%s850_s17 + $0x30] sm:$0xf0]  ;;  %v692_v17 = vor.u32 %v778_v10, %v691_v9 }
  0x21   : > { %757 = vmatmul.msk.bf16.vlgmr.msra.gmra.mxu0 %vm355_vm0, %v794_v55  ;;  %806 = vset.pattern.permute.xlu0 %v815_v11  ;;  %v768_v15 = vld [vmem:[%s850_s17 + $0x14] sm:$0xf]  ;;  %v665_v16 = vld [vmem:[%s850_s17 + $0x2c] sm:$0xf0]  ;;  %v672_v18 = vor.u32 %v772_v14, %v671_v13  ;;  %v771_v20 = vld [vmem:[%s850_s17 + $0x28] sm:$0xf0] }
  0x22   : > { %758 = vmatmul.msk.bf16.vlgmr.msra.gmra.mxu1 %vm355_vm0, %v794_v55  ;;  %759 = vmatmul.msk.bf16.vlgmr.msra.gmra.mxu2 %vm355_vm0, %v794_v55  ;;  %v663_v19 = vld [vmem:[%s850_s17 + $0x10] sm:$0xf]  ;;  %v668_v21 = vor.u32 %v768_v15, %v665_v16 }
  0x23   : > { %447 = vmatpush.bf16.msrb.mxu2 %v756_v52  ;;  %433 = vmatpush.bf16.msrb.mxu1 %v752_v56  ;;  %v664_v22 = vor.u32 %v771_v20, %v663_v19 }
  0x24   : > { %760 = vmatmul.msk.bf16.vlgmr.msra.gmra.mxu3 %vm355_vm0, %v794_v55  ;;  %419 = vmatpush.bf16.msrb.mxu0 %v748_v61 }
  0x25   : > { %523 = vperm.xlu0 %806, %v520_v6  }
  0x27   : > { %448 = vmatpush.bf16.msrb.mxu2 %v728_v62  ;;  %434 = vmatpush.bf16.msrb.mxu1 %v724_v1 }
  0x28   : > { %420 = vmatpush.bf16.msrb.mxu0 %v720_v7 }
  0x2b   : > { %449 = vmatpush.bf16.msrb.mxu2 %v700_v8  ;;  %435 = vmatpush.bf16.msrb.mxu1 %v696_v12 }
  0x2c   : > { %421 = vmatpush.bf16.msrb.mxu0 %v692_v17 }
  0x2f   : > { %450 = vmatpush.bf16.msrb.mxu2 %v672_v18  ;;  %436 = vmatpush.bf16.msrb.mxu1 %v668_v21 }
  0x30   : > { %422 = vmatpush.bf16.msrb.mxu0 %v664_v22 }
  0x32   : > { %762 = vmatmul.msk.bf16.vlgmr.msrb.gmra.mxu1 %vm355_vm0, %v794_v55  ;;  %763 = vmatmul.msk.bf16.vlgmr.msrb.gmra.mxu2 %vm355_vm0, %v794_v55 }
  0x33   : > { %761 = vmatmul.msk.bf16.vlgmr.msrb.gmra.mxu0 %vm355_vm0, %v794_v55 }
  0x97   : > { %v524_v39 = vpop.permute.xlu0 %523 }
  0x9e   : > { %v368_v23 = vpop.f32.mrf.mxu0 }
  0x9f   : > { %v464_v24 = vrot.slane %v368_v23, 4  ;;  %v382_v25 = vpop.f32.mrf.mxu1 }
  0xa0   : > { %v465_v26 = vrot.slane %v382_v25, 4 }
  0xa1   : > { %v478_v27 = vmax.f32 %v368_v23, %v464_v24 }
  0xa2   : > { %v479_v28 = vmax.f32 %v382_v25, %v465_v26 }
  0xa5   : > { %v396_v29 = vpop.f32.mrf.mxu2 }
  0xa6   : > { %v370_v31 = vpop.f32.mrf.mxu0  ;;  %v466_v36 = vrot.slane %v396_v29, 4 }
  0xa7   : > { %v410_v30 = vpop.f32.mrf.mxu3  ;;  %v485_v33 = vmax.f32 %v478_v27, %v370_v31  ;;  %v499_v34 = vrot.slane %v370_v31, 4  ;;  %v384_v35 = vpop.f32.mrf.mxu1 }
  0xa8   : > { %v467_v32 = vrot.slane %v410_v30, 4  ;;  %v486_v37 = vmax.f32 %v479_v28, %v384_v35  ;;  %v500_v38 = vrot.slane %v384_v35, 4  ;;  %v480_v44 = vmax.f32 %v396_v29, %v466_v36 }
  0xa9   : > { %v513_v40 = vmax.f32 %v485_v33, %v499_v34 }
  0xaa   : > { %v514_v41 = vmax.f32 %v486_v37, %v500_v38  ;;  %v481_v42 = vmax.f32 %v410_v30, %v467_v32 }
  0xab   : > { %v526_v43 = vadd.f32 %v524_v39, %v513_v40 }
  0xac   : > { %v527_v45 = vadd.f32 %v524_v39, %v514_v41 }
  0xad   : > { %v398_v46 = vpop.f32.mrf.mxu2  ;;  %v533_v50 = vmax.f32 %v526_v43, 0.0 }
  0xae   : > { %v487_v47 = vmax.f32 %v480_v44, %v398_v46  ;;  %v501_v48 = vrot.slane %v398_v46, 4  ;;  %v534_v51 = vmax.f32 %v527_v45, 0.0 }
  0xaf   : > { %v412_v49 = vpop.f32.mrf.mxu3  ;;  %v438_v55 = vpop.f32.mrf.mxu1 }
  0xb0   : > { %v488_v52 = vmax.f32 %v481_v42, %v412_v49  ;;  %v502_v53 = vrot.slane %v412_v49, 4  ;;  %v424_v54 = vpop.f32.mrf.mxu0  ;;  %v515_v56 = vmax.f32 %v487_v47, %v501_v48  ;;  %v469_v58 = vrot.slane %v438_v55, 4 }
  0xb1   : > { %v468_v57 = vrot.slane %v424_v54, 4  ;;  %v540_v61 = vpack.c.bf16 %v534_v51, %v533_v50 }
  0xb2   : > { %v516_v59 = vmax.f32 %v488_v52, %v502_v53  ;;  %v528_v60 = vadd.f32 %v524_v39, %v515_v56  ;;  %v483_v1 = vmax.f32 %v438_v55, %v469_v58 }
  0xb3   : > { %v482_v0 = vmax.f32 %v424_v54, %v468_v57  ;;  %v548_v4 = vrot.slane %v540_v61, 2 }
  0xb4   : > { %v529_v62 = vadd.f32 %v524_v39, %v516_v59  ;;  %v535_v63 = vmax.f32 %v528_v60, 0.0 }
  0xb5   : > { %v452_v3 = vpop.f32.mrf.mxu2  ;;  %v557_v18 = vsel %vm554_vm2, %v540_v61, %v548_v4 }
  0xb6   : > { %v536_v2 = vmax.f32 %v529_v62, 0.0  ;;  %v470_v14 = vrot.slane %v452_v3, 4 }
  0xb7   : > { %v440_v7 = vpop.f32.mrf.mxu1 }
  0xb8   : > { %v541_v5 = vpack.c.bf16 %v536_v2, %v535_v63  ;;  %v426_v6 = vpop.f32.mrf.mxu0  ;;  %v490_v10 = vmax.f32 %v483_v1, %v440_v7  ;;  %v504_v11 = vrot.slane %v440_v7, 4  ;;  %v484_v22 = vmax.f32 %v452_v3, %v470_v14 }
  0xb9   : > { %v489_v8 = vmax.f32 %v482_v0, %v426_v6  ;;  %v503_v9 = vrot.slane %v426_v6, 4 }
  0xba   : > { %v549_v12 = vrot.slane %v541_v5, 4  ;;  %v550_v13 = vrot.slane %v541_v5, 6  ;;  %v518_v16 = vmax.f32 %v490_v10, %v504_v11 }
  0xbb   : > { %v517_v15 = vmax.f32 %v489_v8, %v503_v9 }
  0xbc   : > { %v561_v17 = vsel %vm558_vm1, %v549_v12, %v550_v13  ;;  %v531_v20 = vadd.f32 %v524_v39, %v518_v16 }
  0xbd   : > { %v530_v19 = vadd.f32 %v524_v39, %v517_v15  ;;  %v563_v21 = vsel %vm562_vm3, %v557_v18, %v561_v17  ;;  %v454_v23 = vpop.f32.mrf.mxu2 }
  0xbe   : > { %573 = vst [vmem:[%s170_s25] sm:$0xff] %v563_v21  ;;  %v538_v25 = vmax.f32 %v531_v20, 0.0  ;;  %v491_v26 = vmax.f32 %v484_v22, %v454_v23  ;;  %v505_v27 = vrot.slane %v454_v23, 4 }
  0xbf   : > { %v537_v24 = vmax.f32 %v530_v19, 0.0 }
  0xc0   : > { %v519_v28 = vmax.f32 %v491_v26, %v505_v27 }
  0xc1   : > { %v542_v29 = vpack.c.bf16 %v538_v25, %v537_v24 }
  0xc2   : > { %v532_v30 = vadd.f32 %v524_v39, %v519_v28 }
  0xc3   : > { %v551_v32 = vrot.slane %v542_v29, 2 }
  0xc4   : > { %v539_v31 = vmax.f32 %v532_v30, 0.0 }
  0xc5   : > { %v566_v36 = vsel %vm554_vm2, %v542_v29, %v551_v32 }
  0xc6   : > { %v543_v33 = vpack.c.bf16 %v539_v31, %v539_v31 }
  0xc8   : > { %v552_v34 = vrot.slane %v543_v33, 4  ;;  %v553_v35 = vrot.slane %v543_v33, 6 }
  0xca   : > { %v569_v37 = vsel %vm558_vm1, %v552_v34, %v553_v35 }
  0xcb   : > { %v570_v38 = vsel %vm562_vm3, %v566_v36, %v569_v37 }
  0xcc   : > { %578 = vst.msk [vmem:[%s170_s25 + $0x8] sm:$0x3f] %vm577_vm7, %v570_v38 }
  0xcd PF: > { %s13_s12 = sadd.s32 1, %s813_s12  }
  0xce   : > { %p10_p4 = scmp.ge.s32.totalorder %s13_s12, 4  }
  0xd0   :  { %12 = sbr.rel (!%p10_p4) target bundleno = 1 (0x1), region = 62 }

// kernel: conv_autoencoder_two_forward.7
= control target key start
LH: loop header
LB: loop body
LE: loop exit
PB: predicated region body
PF: predicated region fallthrough
CT: control target
= control target key end

     0   :  { %10 = vsyncpa [#allocation3], 0  ;;  %s965_s0 = inlined_call_operand.vmem [shape: bf16[2,64,208], index: 0, kind: input, shape index: {}]   ;;  %s966_s1 = inlined_call_operand.vmem [shape: bf16[16,64], index: 1, kind: input, shape index: {}]   ;;  %s967_s2 = inlined_call_operand.vmem [shape: f32[4,1], index: 2, kind: input, shape index: {}]   ;;  %s968_s3 = inlined_call_operand.vmem [shape: bf16[208,40], index: 3, kind: input, shape index: {}]   ;;  %s969_s4 = inlined_call_operand.vmem [shape: f32[1,10], index: 4, kind: input, shape index: {}]   ;;  %s970_s5 = inlined_call_operand.hbm [shape: f32[2,1,10], index: 5, kind: output, shape index: {}]  }
   0x1   :  { %12 = vsyncpa [#allocation3 + $0x1], 0  ;;  %s832_s18 = smov 0   ;;  %s834_s19 = smov 0  }
   0x2   :  { %s836_s20 = smov 0   ;;  %s838_s21 = smov 0  }
   0x3 LB: > { %s853_s22 = sadd.s32 4294967295, %s796_s21   ;;  %s568_s23 = sadd.s32 4294967294, %s796_s21   ;;  %s796_s21 = sphi %s838_s21, %s976_s21   ;;  %s792_s20 = sphi %s836_s20, %s975_s20   ;;  %s788_s19 = sphi %s834_s19, %s974_s19   ;;  %s784_s18 = sphi %s832_s18, %s973_s18  }
   0x4   : > { %s857_s24 = sadd.s32 1, %s796_s21   ;;  %s135_s25 = sadd.s32 1, %s792_s20 }
   0x5   : > { %s132_s26 = ssub.s32 %s796_s21, %s857_s24  ;;  %p145_p0 = scmp.ne.s32.totalorder %s792_s20, %s788_s19 }
   0x6   : > { %p133_p1 = scmp.eq.s32.totalorder %s132_s26, 0  ;;  %p146_p2 = scmp.eq.s32.totalorder %s853_s22, 1 }
   0x7   : > { %p151_p3 = scmp.ne.s32.totalorder %s788_s19, %s784_s18  ;;  %p152_p4 = scmp.eq.s32.totalorder %s568_s23, 1 }
   0x8   : > { %s868_s27 = scalar_select %p133_p1, %s792_s20, %s135_s25  }
   0x9   : > { %p870_p5 = por %p146_p2, %p145_p0  ;;  %p874_p6 = por %p152_p4, %p151_p3 }
   0xa   : > { %p571_p7 = scmp.ge.s32.totalorder %s796_s21, 1  ;;  %p190_p8 = scmp.lt.s32.totalorder %s796_s21, 3 }
   0xc   : > { %p191_p9 = pnand %p571_p7, %p190_p8 }
   0xd   : > { %p217_p10 = scmp.lt.s32.totalorder (!%p191_p9), %s853_s22, 1  ;;  %s799_s8 = smov (!%p191_p9), 118  }
   0xe   : > { %194 = sbr.rel (%p191_p9) target bundleno = 464 (0x1d0), region = 40  ;;  %s801_s10 = smov (!%p191_p9), 98  }
   0xf   : > { %s215_s13 = sand.u32 (!%p191_p9), 1, %s788_s19   ;;  %s509_s16 = scalar_lea.hbm (!%p191_p9), %s970_s5, %s853_s22 }
  0x10   : > { %s216_s17 = scalar_lea.vmem (!%p191_p9), [#allocation2], %s215_s13  ;;  %s513_s25 = sshll.u32 (!%p191_p9), %s509_s16, 4  ;;  %s514_s25 = int_to_ptr.hbm [resolvable:$true] %s513_s25 }
  0x11   : > { %s511_s23 = sshll.u32 (!%p191_p9), %s216_s17, 4  ;;  %s501_s26 = scalar_lea.sflag (!%p191_p9), [#allocation3], %s215_s13  ;;  %s512_s23 = int_to_ptr.vmem [resolvable:$true] %s511_s23 }
  0x12   : > { %s748_s30 = sshra.s32 (!%p191_p9), %s514_s25, 4  ;;  %s749_s30 = int_to_ptr.hbm [resolvable:$true] %s748_s30 }
  0x13   : > { %v328_v0 = vld [vmem:[%s967_s2] sm:$0xf]  ;;  %v798_v1 = vmov 0   ;;  %v684_v2 = vld [vmem:[%s968_s3 + $0x38] sm:$0xff]  ;;  %s218_s9 = scalar_select %p217_p10, %s853_s22, 1  ;;  %v683_v3 = vld [vmem:[%s968_s3 + $0x30] sm:$0xff] }
  0x14   : > { %733 = vset.pattern.permute.xlu0 %v798_v1  ;;  %448 = vmatpush.bf16.msra.mxu2 %v684_v2  ;;  %v682_v4 = vld [vmem:[%s968_s3 + $0x28] sm:$0xff]  ;;  %v668_v29 = vld [vmem:[%s966_s1] sm:$0xff]  ;;  %vm278_vm0 = vcmask 523264   ;;  %v680_v32 = vld [vmem:[%s968_s3 + $0x18] sm:$0xff]  ;;  %vm444_vm1 = vcmask 654336   ;;  %vm498_vm2 = vcmask 73728   ;;  %p755_p0 = scmp.lt.s32.totalorder %s749_s30, %s970_s5 }
  0x15   : > { %331 = vperm.xlu0 %733, %v328_v0   ;;  %s667_s12 = sshll.u32 %s218_s9, 6  ;;  %v681_v30 = vld [vmem:[%s968_s3 + $0x20] sm:$0xff]  ;;  %v688_v33 = vld [vmem:[%s968_s3 + $0x58] sm:$0xff]  ;;  %v679_v34 = vld [vmem:[%s968_s3 + $0x10] sm:$0xff]  ;;  %s800_s9 = smov 108  }
  0x16   : > { %s221_s15 = scalar_lea.vmem %s965_s0, %s667_s12  ;;  %v689_v31 = vld [vmem:[%s968_s3 + $0x60] sm:$0xff]  ;;  %v687_v35 = vld [vmem:[%s968_s3 + $0x50] sm:$0xff]  ;;  %v678_v36 = vld [vmem:[%s968_s3 + $0x8] sm:$0xff]  ;;  %s750_s6 = scalar_lea.hbm %s749_s30, 1 }
  0x17   : > { %v604_v5 = vld [vmem:[%s221_s15 + $0x30] sm:$0xf]  ;;  %v676_v6 = vld [vmem:[%s221_s15 + $0x34] sm:$0xf0]  ;;  %v675_v7 = vld [vmem:[%s221_s15 + $0x34] sm:$0xf]  ;;  %464 = vmatpush.bf16.msra.mxu3 %v689_v31  ;;  %p751_p11 = scmp.ne.s32.totalorder %s749_s30, %s750_s6 }
  0x18   : > { %v605_v8 = vor.u32 %v676_v6, %v604_v5  ;;  %v606_v9 = vld [vmem:[%s221_s15 + $0x38] sm:$0xf0]  ;;  %v596_v10 = vld [vmem:[%s221_s15 + $0x20] sm:$0xf]  ;;  %v674_v11 = vld [vmem:[%s221_s15 + $0x24] sm:$0xf0]  ;;  %449 = vmatpush.bf16.msra.mxu2 %v683_v3 }
  0x19   : > { %v609_v12 = vor.u32 %v675_v7, %v606_v9  ;;  %v673_v13 = vld [vmem:[%s221_s15 + $0x24] sm:$0xf]  ;;  %v598_v14 = vld [vmem:[%s221_s15 + $0x28] sm:$0xf0]  ;;  %v597_v15 = vor.u32 %v674_v11, %v596_v10  ;;  %v588_v17 = vld [vmem:[%s221_s15 + $0x10] sm:$0xf]  ;;  %p752_p12 = pnand %p751_p11, %p870_p5 }
  0x1a   : > { %286 = vmatpush.bf16.msra.mxu0 %v605_v8  ;;  %v601_v16 = vor.u32 %v673_v13, %v598_v14  ;;  %v672_v18 = vld [vmem:[%s221_s15 + $0x14] sm:$0xf0]  ;;  %v671_v19 = vld [vmem:[%s221_s15 + $0x14] sm:$0xf]  ;;  %v590_v20 = vld [vmem:[%s221_s15 + $0x18] sm:$0xf0] }
  0x1b   : > { %300 = vmatpush.bf16.msra.mxu1 %v609_v12  ;;  %v589_v21 = vor.u32 %v672_v18, %v588_v17  ;;  %v593_v22 = vor.u32 %v671_v19, %v590_v20  ;;  %v580_v23 = vld [vmem:[%s221_s15] sm:$0xf]  ;;  %v670_v24 = vld [vmem:[%s221_s15 + $0x4] sm:$0xf0]  ;;  %v669_v25 = vld [vmem:[%s221_s15 + $0x4] sm:$0xf]  ;;  %465 = vmatpush.bf16.msra.mxu3 %v688_v33  ;;  %p753_p13 = pneg %p752_p12 }
  0x1c   : > { %450 = vmatpush.bf16.msra.mxu2 %v682_v4  ;;  %v582_v26 = vld [vmem:[%s221_s15 + $0x8] sm:$0xf0]  ;;  %v581_v27 = vor.u32 %v670_v24, %v580_v23  ;;  %v677_v38 = vld [vmem:[%s968_s3] sm:$0xff] }
  0x1d   : > { %v585_v28 = vor.u32 %v669_v25, %v582_v26  ;;  %v686_v37 = vld [vmem:[%s968_s3 + $0x48] sm:$0xff]  ;;  %v685_v39 = vld [vmem:[%s968_s3 + $0x40] sm:$0xff] }
  0x1e   : > { %287 = vmatpush.bf16.msra.mxu0 %v597_v15  ;;  %v474_v5 = vld [vmem:[%s969_s4] sm:$0x1] }
  0x1f   : > { %301 = vmatpush.bf16.msra.mxu1 %v601_v16  ;;  %466 = vmatpush.bf16.msra.mxu3 %v687_v35 }
  0x20   : > { %451 = vmatpush.bf16.msra.mxu2 %v681_v30 }
  0x22   : > { %288 = vmatpush.bf16.msra.mxu0 %v589_v21 }
  0x23   : > { %302 = vmatpush.bf16.msra.mxu1 %v593_v22  ;;  %467 = vmatpush.bf16.msra.mxu3 %v686_v37 }
  0x24   : > { %452 = vmatpush.bf16.msra.mxu2 %v680_v32 }
  0x26   : > { %289 = vmatpush.bf16.msra.mxu0 %v581_v27 }
  0x27   : > { %303 = vmatpush.bf16.msra.mxu1 %v585_v28  ;;  %468 = vmatpush.bf16.msra.mxu3 %v685_v39 }
  0x28   : > { %453 = vmatpush.bf16.msra.mxu2 %v679_v34 }
  0x29   : > { %610 = vmatmul.msk.bf16.vlgmr.msra.gmra.mxu0 %vm278_vm0, %v668_v29 }
  0x2a   : > { %611 = vmatmul.msk.bf16.vlgmr.msra.gmra.mxu1 %vm278_vm0, %v668_v29 }
  0x2c   : > { %454 = vmatpush.bf16.msra.mxu2 %v678_v36 }
  0x30   : > { %455 = vmatpush.bf16.msra.mxu2 %v677_v38 }
  0x87   : > { %v332_v52 = vpop.permute.xlu0 %331 }
  0xa6   : > { %v291_v40 = vpop.f32.mrf.mxu0 }
  0xa7   : > { %v305_v41 = vpop.f32.mrf.mxu1  ;;  %v312_v42 = vrot.slane %v291_v40, 4 }
  0xa8   : > { %v313_v43 = vrot.slane %v305_v41, 4 }
  0xa9   : > { %v316_v44 = vmax.f32 %v291_v40, %v312_v42 }
  0xaa   : > { %v317_v45 = vmax.f32 %v305_v41, %v313_v43 }
  0xae   : > { %v293_v46 = vpop.f32.mrf.mxu0 }
  0xaf   : > { %v318_v47 = vmax.f32 %v316_v44, %v293_v46  ;;  %v322_v48 = vrot.slane %v293_v46, 4  ;;  %v307_v49 = vpop.f32.mrf.mxu1 }
  0xb0   : > { %v319_v50 = vmax.f32 %v317_v45, %v307_v49  ;;  %v323_v51 = vrot.slane %v307_v49, 4 }
  0xb1   : > { %v326_v53 = vmax.f32 %v318_v47, %v322_v48 }
  0xb2   : > { %v327_v54 = vmax.f32 %v319_v50, %v323_v51 }
  0xb3   : > { %v334_v55 = vadd.f32 %v332_v52, %v326_v53 }
  0xb4   : > { %v335_v56 = vadd.f32 %v332_v52, %v327_v54 }
  0xb5   : > { %v336_v57 = vmax.f32 %v334_v55, 0.0 }
  0xb6   : > { %v337_v58 = vmax.f32 %v335_v56, 0.0 }
  0xb7   : > { %v338_v59 = vpack.c.bf16 %v336_v57, %v336_v57 }
  0xb8   : > { %v339_v60 = vpack.c.bf16 %v337_v58, %v337_v58 }
  0xb9   : > { %456 = vmatmul.bf16.vlgmr.msra.gmra.mxu2 %v338_v59 }
  0xba   : > { %664 = vmatmul.msk.bf16.vlgmr.msra.gmra.mxu3 %vm444_vm1, %v339_v60 }
 0x13c   : > { %v457_v61 = vpop.f32.mrf.mxu2 }
 0x13d   : > { %v470_v62 = vpop.f32.mrf.mxu3 }
 0x13e   : > { %v471_v63 = vadd.f32 %v470_v62, %v457_v61 }
 0x140   : > { %477 = vst [vmem:[#allocation1] sm:$0xff] %v471_v63  ;;  %v475_v8 = vadd.f32 %v474_v5, %v471_v63 }
 0x144   : > { %v459_v0 = vpop.f32.mrf.mxu2 }
 0x145   : > { %v472_v1 = vpop.f32.mrf.mxu3 }
 0x147   : > { %v479_v2 = vld [vmem:[#allocation1 + $0x1] ss:$9 sm:$0xff] }
 0x148   : > { %480 = vrot.lane.b32.xlu0 %v479_v2, %s799_s8  ;;  %484 = vst [vmem:[#allocation1] sm:$0xff] %v471_v63  ;;  %s754_s8 = scalar_lea.hbm %s970_s5, 2 }
 0x149   : > { %p756_p1 = scmp.lt.s32.totalorder %s754_s8, %s750_s6 }
 0x14b   : > { %p757_p2 = por %p756_p1, %p755_p0 }
 0x14d   : > { %p758_p3 = pnand %p757_p2, %p753_p13 }
 0x14f   : > { %v486_v3 = vld [vmem:[#allocation1 + $0x2] ss:$9 sm:$0xff] }
 0x150   : > { %487 = vrot.lane.b32.xlu1 %v486_v3, %s800_s9  ;;  %491 = vst [vmem:[#allocation1] sm:$0xff] %v471_v63 }
 0x157   : > { %v493_v4 = vld [vmem:[#allocation1 + $0x3] ss:$9 sm:$0xff] }
 0x158   : > { %494 = vrot.lane.b32.xlu1 %v493_v4, %s801_s10 }
 0x1ba   : > { %v481_v7 = vpop.permute.xlu0 %480 }
 0x1bb   : > { %v483_v9 = vadd.f32 %v481_v7, %v475_v8 }
 0x1c2   : > { %v488_v6 = vpop.permute.xlu1 %487 }
 0x1c3   : > { %v490_v10 = vadd.f32 %v488_v6, %v483_v9 }
 0x1ca   : > { %v495_v11 = vpop.permute.xlu1 %494 }
 0x1cb   : > { %v497_v12 = vadd.f32 %v495_v11, %v490_v10 }
 0x1cd   : > { %499 = vst.msk [vmem:[%s216_s17] sm:$0x1] %vm498_vm2, %v497_v12 }
 0x1ce   : > { %761 = shalt.err (!%p758_p3)
}
 0x1cf   : > { %690 = dma.vmem_to_hbm [thread:$0]  (%p870_p5), %s512_s23, 16, %s514_s25, %s501_s26  }
 0x1d0 PF: > { %p696_p4 = scmp.ge.s32.totalorder %s796_s21, 2  ;;  %s525_s11 = sand.u32 1, %s784_s18  }
 0x1d1   : > { %s526_s12 = scalar_lea.sflag [#allocation3], %s525_s11 }
 0x1d2   : > { %p693_p7 = pnand %p696_p4, %p874_p6 }
 0x1d4   : > { %p694_p8 = pneg %p693_p7 }
 0x1d6   : > { %779 = dma.done.wait (%p694_p8), %s526_s12, 16  }
 0x1d7   : > { %781 = vsyncadd (%p694_p8), %s526_s12, 4294967280  ;;  %p15_p9 = scmp.ge.s32.totalorder %s857_s24, 4   ;;  %s973_s18 = smov %s788_s19 }
 0x1d8   : > { %s974_s19 = smov %s792_s20  ;;  %s975_s20 = smov %s868_s27 }
 0x1d9   : > { %s976_s21 = smov %s857_s24  ;;  %17 = sbr.rel (!%p15_p9) target bundleno = 3 (0x3), region = 78 }
 0x1de   :  { %531 = vsyncpa [#allocation3], 1 }
 0x1df   :  { %533 = vsyncpa [#allocation3 + $0x1], 1 }

</bundles_post_ra>
